<compile_context>
chip_gen: v6e
topology: v6e:2x2x1
jax: 0.10.0
libtpu: 0.0.40
codegen_flags: <defaults>
</compile_context>

<pallas_src>
import math
import jax
import jax.numpy as jnp
from jax import lax
from jax.experimental import pallas as pl
from jax.experimental.pallas import tpu as pltpu

# ----------------------------- synthetic config ------------------------------
VOCAB = 128          # (orig: 42384)
D = 32               # hidden size (orig: 1024)
H = 4                # attention heads (orig: 16)
DH = D // H
FFN = 64             # intermediate size (orig: 4096)
N_LAYERS = 4         # decoder layers (orig: 24)
FIRST_X_ATTN = 2     # first cross-attention layer index
CTX_DIM = 48         # context_dim (orig: 1280)
PAD_ID = 1           # BioGPT pad token id
CLS_TOKEN_ID = 42    # (orig: 42383, shrunk to fit synthetic vocab)
MAX_POS = 64
EMBED_SCALE = math.sqrt(D)   # scale_embedding=True in BioGptConfig
LN_EPS = 1e-5
NEG_INF = -1e9
SCALING = DH ** -0.5
BF16 = jnp.bfloat16

QUERY_TILE = 256     # self/cross-attention query-row tile
VOCAB_TILE = 1024    # LM-head vocab tile (multiple of 256 at production sizes)


def _round_up(n, m):
    return ((n + m - 1) // m) * m


def _tpu_vmem_bytes():
    try:
        return int(pltpu.get_tpu_info().vmem_capacity_bytes)
    except Exception:
        return 128 * 1024 * 1024


_VMEM_BYTES = _tpu_vmem_bytes()
# ~56 MiB on v7x (64 MiB physical, leave DMA headroom), 100 MiB on v5e/v6e (128 MiB).
VMEM_LIMIT = int(min(_VMEM_BYTES * 7 // 8, 100 * 1024 * 1024))
# FFN / LM-head row tile: 512 where VMEM is 128 MiB (v5e/v6e), 256 on v7x (64 MiB).
ROW_TILE = 512 if _VMEM_BYTES > (64 << 20) else 256

# single-buffer pipeline mode for constant (never re-fetched) weight/bias blocks
try:
    _SINGLE_BUFFER = pl.Buffered(buffer_count=1)
except Exception:      # pragma: no cover - older API fallback
    _SINGLE_BUFFER = None


def _const_spec(shape):
    """BlockSpec for a block whose index_map is constant (weights / biases / LN params)."""
    nd = len(shape)
    imap = lambda *_: (0,) * nd
    if _SINGLE_BUFFER is not None:
        try:
            return pl.BlockSpec(shape, imap, pipeline_mode=_SINGLE_BUFFER)
        except TypeError:
            pass
    return pl.BlockSpec(shape, imap)


def _cparams(*sem):
    return pltpu.CompilerParams(dimension_semantics=sem, vmem_limit_bytes=VMEM_LIMIT)


# --------------------------- in-kernel helpers --------------------------------

def _layernorm(x, g, b):
    """f32 layer norm; g/b are (1, D) and broadcast over rows."""
    mu = jnp.mean(x, axis=-1, keepdims=True)
    var = jnp.mean(jnp.square(x - mu), axis=-1, keepdims=True)
    return (x - mu) * lax.rsqrt(var + LN_EPS) * g + b


def _gelu_tanh(x):
    # tanh-approximate GELU -> transcendental goes to the EUP slot
    return 0.5 * x * (1.0 + jnp.tanh(0.7978845608028654 * (x + 0.044715 * x * x * x)))


def _softmax_rows(s):
    s = s - jnp.max(s, axis=-1, keepdims=True)
    p = jnp.exp(s)
    return p * pl.reciprocal(jnp.sum(p, axis=-1, keepdims=True), approx=True)


# ------------------------------- Pallas kernels -------------------------------

def _self_attn_kernel(x_ref, mask_ref, g_ref, b_ref, wq_ref, bq_ref,
                      wkv_ref, bkv_ref, wo_ref, bo_ref, o_ref,
                      q_scr, k_scr, v_scr, o_scr):
    """Pre-LN causal self-attention for one (batch, query-tile) grid point."""
    Tp = x_ref.shape[1]
    TQ = o_ref.shape[1]
    q0 = pl.multiple_of(pl.program_id(1) * TQ, TQ)

    # K/V from the full (padded) sequence: LN -> fused KV matmul (bf16 MXU, f32 acc)
    hs_full = _layernorm(x_ref[0], g_ref[...], b_ref[...])
    kvp = jnp.dot(hs_full.astype(BF16), wkv_ref[...],
                  preferred_element_type=jnp.float32) + bkv_ref[...]        # (Tp, 2D)

    # Q only for this query tile (attention scaling pre-folded into wq/bq at init)
    x_q = x_ref[0, pl.ds(q0, TQ), :]                                        # (TQ, D)
    hs_q = _layernorm(x_q, g_ref[...], b_ref[...])
    qp = jnp.dot(hs_q.astype(BF16), wq_ref[...],
                 preferred_element_type=jnp.float32) + bq_ref[...]          # (TQ, D)

    # static head split into head-major bf16 VMEM scratch
    for hh in range(H):
        q_scr[hh] = qp[:, hh * DH:(hh + 1) * DH].astype(BF16)
        k_scr[hh] = kvp[:, hh * DH:(hh + 1) * DH].astype(BF16)
        v_scr[hh] = kvp[:, D + hh * DH:D + (hh + 1) * DH].astype(BF16)

    # causal + key-padding mask built in-kernel (no (B*H,T,T) mask array in HBM)
    row = q0 + lax.broadcasted_iota(jnp.int32, (TQ, Tp), 0)
    col = lax.broadcasted_iota(jnp.int32, (TQ, Tp), 1)
    allowed = (col <= row) & (mask_ref[0] > 0)

    def head_body(hh, carry):       # only one head's (TQ, Tp) scores live at a time
        s = lax.dot_general(q_scr[hh], k_scr[hh], (((1,), (1,)), ((), ())),
                            preferred_element_type=jnp.float32)             # (TQ, Tp)
        p = _softmax_rows(jnp.where(allowed, s, NEG_INF))
        o_scr[hh] = lax.dot_general(p.astype(BF16), v_scr[hh],
                                    (((1,), (0,)), ((), ())),
                                    preferred_element_type=jnp.float32).astype(BF16)
        return carry
    lax.fori_loop(0, H, head_body, 0)

    # small static relayout of the already-reduced per-head outputs, then fused out-proj
    a = jnp.concatenate([o_scr[hh] for hh in range(H)], axis=-1)             # (TQ, D)
    out = jnp.dot(a, wo_ref[...], preferred_element_type=jnp.float32) + bo_ref[...]
    o_ref[0] = x_q + out


def _cross_attn_kernel(x_ref, ctx_ref, g_ref, b_ref, wq_ref, bq_ref,
                       wkv_ref, bkv_ref, wo_ref, bo_ref, o_ref,
                       q_scr, k_scr, v_scr, o_scr):
    """Pre-LN cross-attention for one (batch, query-tile) grid point (context unmasked)."""
    x_q = x_ref[0]                                                          # (TQ, D)
    hs = _layernorm(x_q, g_ref[...], b_ref[...])
    qp = jnp.dot(hs.astype(BF16), wq_ref[...],
                 preferred_element_type=jnp.float32) + bq_ref[...]
    kvp = jnp.dot(ctx_ref[0].astype(BF16), wkv_ref[...],
                  preferred_element_type=jnp.float32) + bkv_ref[...]        # (Tc, 2D)

    for hh in range(H):
        q_scr[hh] = qp[:, hh * DH:(hh + 1) * DH].astype(BF16)
        k_scr[hh] = kvp[:, hh * DH:(hh + 1) * DH].astype(BF16)
        v_scr[hh] = kvp[:, D + hh * DH:D + (hh + 1) * DH].astype(BF16)

    def head_body(hh, carry):
        s = lax.dot_general(q_scr[hh], k_scr[hh], (((1,), (1,)), ((), ())),
                            preferred_element_type=jnp.float32)             # (TQ, Tc)
        p = _softmax_rows(s)          # context has no padding -> no mask needed
        o_scr[hh] = lax.dot_general(p.astype(BF16), v_scr[hh],
                                    (((1,), (0,)), ((), ())),
                                    preferred_element_type=jnp.float32).astype(BF16)
        return carry
    lax.fori_loop(0, H, head_body, 0)

    a = jnp.concatenate([o_scr[hh] for hh in range(H)], axis=-1)
    out = jnp.dot(a, wo_ref[...], preferred_element_type=jnp.float32) + bo_ref[...]
    o_ref[0] = x_q + out


def _ffn_kernel(x_ref, g_ref, b_ref, w1_ref, b1_ref, w2_ref, b2_ref, o_ref):
    """Fused pre-LN FFN block: LN -> fc1 -> GELU -> fc2 -> residual (row-tiled)."""
    x = x_ref[...]
    hs = _layernorm(x, g_ref[...], b_ref[...])
    h1 = jnp.dot(hs.astype(BF16), w1_ref[...],
                 preferred_element_type=jnp.float32) + b1_ref[...]
    g = _gelu_tanh(h1)
    h2 = jnp.dot(g.astype(BF16), w2_ref[...],
                 preferred_element_type=jnp.float32) + b2_ref[...]
    o_ref[...] = x + h2


def _lm_head_kernel(x_ref, g_ref, b_ref, w_ref, o_ref, xn_scr):
    """Final LN (once per row tile, cached in bf16 scratch) + tied LM head, vocab-tiled.
    Contracts on the feature dim of the (tv, D) embedding tile (trans_b) so no transposed
    weight copy is ever materialized in HBM."""
    @pl.when(pl.program_id(1) == 0)
    def _():
        xn_scr[...] = _layernorm(x_ref[...], g_ref[...], b_ref[...]).astype(BF16)
    o_ref[...] = lax.dot_general(xn_scr[...], w_ref[...],
                                 (((1,), (1,)), ((), ())),
                                 preferred_element_type=jnp.float32)


# ------------------------------- kernel wrappers -------------------------------

def self_attention_block(x, mask3, lp):
    B, Tp, _ = x.shape
    tq = min(Tp, QUERY_TILE)
    nq = Tp // tq
    return pl.pallas_call(
        _self_attn_kernel,
        grid=(B, nq),
        in_specs=[pl.BlockSpec((1, Tp, D), lambda b, q: (b, 0, 0)),
                  pl.BlockSpec((1, 1, Tp), lambda b, q: (b, 0, 0)),
                  _const_spec((1, D)), _const_spec((1, D)),
                  _const_spec((D, D)), _const_spec((1, D)),
                  _const_spec((D, 2 * D)), _const_spec((1, 2 * D)),
                  _const_spec((D, D)), _const_spec((1, D))],
        out_specs=pl.BlockSpec((1, tq, D), lambda b, q: (b, q, 0)),
        out_shape=jax.ShapeDtypeStruct((B, Tp, D), jnp.float32),
        scratch_shapes=[pltpu.VMEM((H, tq, DH), BF16),
                        pltpu.VMEM((H, Tp, DH), BF16),
                        pltpu.VMEM((H, Tp, DH), BF16),
                        pltpu.VMEM((H, tq, DH), BF16)],
        compiler_params=_cparams("parallel", "parallel"),
    )(x, mask3, lp['self_ln_g'], lp['self_ln_b'], lp['q_w'], lp['q_b'],
      lp['kv_w'], lp['kv_b'], lp['o_w'], lp['o_b'])


def cross_attention_block(x, kv, lp):
    B, Tp, _ = x.shape
    Tc, Dc = kv.shape[1], kv.shape[2]
    tq = min(Tp, QUERY_TILE)
    nq = Tp // tq
    return pl.pallas_call(
        _cross_attn_kernel,
        grid=(B, nq),
        in_specs=[pl.BlockSpec((1, tq, D), lambda b, q: (b, q, 0)),
                  pl.BlockSpec((1, Tc, Dc), lambda b, q: (b, 0, 0)),
                  _const_spec((1, D)), _const_spec((1, D)),
                  _const_spec((D, D)), _const_spec((1, D)),
                  _const_spec((Dc, 2 * D)), _const_spec((1, 2 * D)),
                  _const_spec((D, D)), _const_spec((1, D))],
        out_specs=pl.BlockSpec((1, tq, D), lambda b, q: (b, q, 0)),
        out_shape=jax.ShapeDtypeStruct((B, Tp, D), jnp.float32),
        scratch_shapes=[pltpu.VMEM((H, tq, DH), BF16),
                        pltpu.VMEM((H, Tc, DH), BF16),
                        pltpu.VMEM((H, Tc, DH), BF16),
                        pltpu.VMEM((H, tq, DH), BF16)],
        compiler_params=_cparams("parallel", "parallel"),
    )(x, kv, lp['x_ln_g'], lp['x_ln_b'], lp['xq_w'], lp['xq_b'],
      lp['xkv_w'], lp['xkv_b'], lp['xo_w'], lp['xo_b'])


def ffn_block(x, lp):
    B, Tp, Dm = x.shape
    M = B * Tp
    bm = min(ROW_TILE, _round_up(M, 8))
    Mp = _round_up(M, bm)
    x2 = x.reshape(M, Dm)
    if Mp != M:
        x2 = jnp.pad(x2, ((0, Mp - M), (0, 0)))
    out = pl.pallas_call(
        _ffn_kernel,
        grid=(Mp // bm,),
        in_specs=[pl.BlockSpec((bm, Dm), lambda i: (i, 0)),
                  _const_spec((1, Dm)), _const_spec((1, Dm)),
                  _const_spec((Dm, FFN)), _const_spec((1, FFN)),
                  _const_spec((FFN, Dm)), _const_spec((1, Dm))],
        out_specs=pl.BlockSpec((bm, Dm), lambda i: (i, 0)),
        out_shape=jax.ShapeDtypeStruct((Mp, Dm), jnp.float32),
        compiler_params=_cparams("parallel"),
    )(x2, lp['ffn_ln_g'], lp['ffn_ln_b'], lp['fc1_w'], lp['fc1_b'],
      lp['fc2_w'], lp['fc2_b'])
    return out[:M].reshape(B, Tp, Dm)


def lm_head(x, g, b, embed_bf16):
    """x: (B, T, D) real token positions only; embed_bf16: (V, D) tied table, bf16."""
    B, T, Dm = x.shape
    V = embed_bf16.shape[0]
    M = B * T
    bm = min(ROW_TILE, _round_up(M, 8))
    Mp = _round_up(M, bm)
    tv = min(VOCAB_TILE, _round_up(V, 128))
    Vp = _round_up(V, tv)

    x2 = x.reshape(M, Dm)
    if Mp != M:
        x2 = jnp.pad(x2, ((0, Mp - M), (0, 0)))
    w = embed_bf16
    if Vp != V:
        w = jnp.pad(w, ((0, Vp - V), (0, 0)))

    out = pl.pallas_call(
        _lm_head_kernel,
        grid=(Mp // bm, Vp // tv),
        in_specs=[pl.BlockSpec((bm, Dm), lambda i, j: (i, 0)),
                  _const_spec((1, Dm)), _const_spec((1, Dm)),
                  pl.BlockSpec((tv, Dm), lambda i, j: (j, 0))],
        out_specs=pl.BlockSpec((bm, tv), lambda i, j: (i, j)),
        out_shape=jax.ShapeDtypeStruct((Mp, Vp), jnp.float32),
        scratch_shapes=[pltpu.VMEM((bm, Dm), BF16)],
        compiler_params=_cparams("parallel", "arbitrary"),
    )(x2, g, b, w)
    return out[:M, :V].reshape(B, T, V)


# ------------------------------- params / forward ------------------------------

def init_params(key):
    std = 0.02
    ks = jax.random.split(key, 2 + N_LAYERS)

    def nrm(k, shape, dtype=jnp.float32):
        return (std * jax.random.normal(k, shape, jnp.float32)).astype(dtype)

    embed = nrm(ks[0], (VOCAB, D)).at[PAD_ID].set(0.0)   # padding_idx row is zero
    params = {
        'embed_tokens': embed,                            # f32: gather + tied LM head
        'embed_positions': nrm(ks[1], (MAX_POS + 2, D)),  # learned pos-emb with offset 2
        'final_ln_g': jnp.ones((1, D), jnp.float32),
        'final_ln_b': jnp.zeros((1, D), jnp.float32),
        'layers': [],
    }
    for i in range(N_LAYERS):
        lk = jax.random.split(ks[2 + i], 10)
        wq, wk, wv = nrm(lk[0], (D, D)), nrm(lk[1], (D, D)), nrm(lk[2], (D, D))
        lp = {
            'self_ln_g': jnp.ones((1, D), jnp.float32),
            'self_ln_b': jnp.zeros((1, D), jnp.float32),
            # attention scaling folded into the Q projection (no in-kernel multiply)
            'q_w': (wq * SCALING).astype(BF16),
            'q_b': jnp.zeros((1, D), jnp.float32),
            # fused K/V projection; bf16 weights for the MXU
            'kv_w': jnp.concatenate([wk, wv], axis=1).astype(BF16),
            'kv_b': jnp.zeros((1, 2 * D), jnp.float32),
            'o_w': nrm(lk[3], (D, D), BF16), 'o_b': jnp.zeros((1, D), jnp.float32),
            'ffn_ln_g': jnp.ones((1, D), jnp.float32),
            'ffn_ln_b': jnp.zeros((1, D), jnp.float32),
            'fc1_w': nrm(lk[4], (D, FFN), BF16), 'fc1_b': jnp.zeros((1, FFN), jnp.float32),
            'fc2_w': nrm(lk[5], (FFN, D), BF16), 'fc2_b': jnp.zeros((1, D), jnp.float32),
        }
        if i >= FIRST_X_ATTN:
            xk, xv = nrm(lk[7], (CTX_DIM, D)), nrm(lk[8], (CTX_DIM, D))
            lp.update({
                'x_ln_g': jnp.ones((1, D), jnp.float32),
                'x_ln_b': jnp.zeros((1, D), jnp.float32),
                'xq_w': (nrm(lk[6], (D, D)) * SCALING).astype(BF16),
                'xq_b': jnp.zeros((1, D), jnp.float32),
                'xkv_w': jnp.concatenate([xk, xv], axis=1).astype(BF16),
                'xkv_b': jnp.zeros((1, 2 * D), jnp.float32),
                'xo_w': nrm(lk[9], (D, D), BF16), 'xo_b': jnp.zeros((1, D), jnp.float32),
            })
        params['layers'].append(lp)
    return params


def biogpt_forward(params, input_ids, key_value_states):
    B, T0 = input_ids.shape
    T = T0 + 1                                   # CLS appended
    if T <= QUERY_TILE:
        Tp = _round_up(T, 8)                     # pad sequence to a sublane multiple
    else:
        Tp = _round_up(T, QUERY_TILE)            # ... and to a query-tile multiple

    ids = jnp.concatenate(
        [input_ids,
         jnp.full((B, 1), CLS_TOKEN_ID, input_ids.dtype),
         jnp.full((B, Tp - T), PAD_ID, input_ids.dtype)], axis=-1)       # (B, Tp)
    attn_mask = (ids != PAD_ID).astype(jnp.int32)                        # (B, Tp)

    # scaled token embeddings + learned positional embeddings (offset = 2)
    # TODO(synk): pad tokens get position index 1 (same as the prior reference impl);
    #             they are masked out of attention so valid-position outputs are unaffected.
    positions = jnp.cumsum(attn_mask, axis=1) * attn_mask - 1 + 2
    x = (jnp.take(params['embed_tokens'], ids, axis=0) * EMBED_SCALE
         + jnp.take(params['embed_positions'], positions, axis=0)).astype(jnp.float32)

    # pad mask can have holes (internal PAD tokens), so keep the (B,1,Tp) mask array
    # rather than a per-batch length scalar.
    mask3 = attn_mask.reshape(B, 1, Tp)
    kv = key_value_states.astype(jnp.float32)
    embed_bf16 = params['embed_tokens'].astype(BF16)     # tied LM-head table, cast once

    text_cls_embedding = None
    for i, lp in enumerate(params['layers']):
        x = self_attention_block(x, mask3, lp)
        if i >= FIRST_X_ATTN:
            x = cross_attention_block(x, kv, lp)
        x = ffn_block(x, lp)
        if i == FIRST_X_ATTN - 1:
            # hidden_states[first_x_attn_layer] == output of the last unimodal layer;
            # CLS token sits at (unpadded) index T-1 == T0
            text_cls_embedding = x[:, T0, :]

    # logits only for the T0 real token positions (drops CLS + padding before the LM head)
    logits = lm_head(x[:, :T0], params['final_ln_g'], params['final_ln_b'], embed_bf16)
    return {'logits': logits, 'text_embedding': text_cls_embedding}


# ------------------------------------ main ------------------------------------

if __name__ == "__main__":
    key = jax.random.PRNGKey(0)
    kp, kid, kkv = jax.random.split(key, 3)

    params = init_params(kp)

    B, T0, Tc = 2, 8, 4
    input_ids = jax.random.randint(kid, (B, T0), 0, VOCAB, dtype=jnp.int32)
    # add some padding in the middle/end of sequence 1 to exercise the mask path
    input_ids = input_ids.at[1, -2:].set(PAD_ID)
    key_value_states = jax.random.normal(kkv, (B, Tc, CTX_DIM), jnp.float32)

    fwd = jax.jit(biogpt_forward)
    out = fwd(params, input_ids, key_value_states)
    jax.block_until_ready(out)

    assert out['logits'].shape == (B, T0, VOCAB), out['logits'].shape
    assert out['text_embedding'].shape == (B, D), out['text_embedding'].shape
    assert bool(jnp.all(jnp.isfinite(out['logits'])))
    assert bool(jnp.all(jnp.isfinite(out['text_embedding'])))
    print("KERNEL_OK")
</pallas_src>

<mosaic_0001>
module attributes {stable_mosaic.version = 11 : i64} {
  func.func @_ffn_kernel(%arg0: i32, %arg1: memref<32x32xf32, #tpu.memory_space<vmem>>, %arg2: memref<1x32xf32, #tpu.memory_space<vmem>>, %arg3: memref<1x32xf32, #tpu.memory_space<vmem>>, %arg4: memref<32x64xbf16, #tpu.memory_space<vmem>>, %arg5: memref<1x64xf32, #tpu.memory_space<vmem>>, %arg6: memref<64x32xbf16, #tpu.memory_space<vmem>>, %arg7: memref<1x32xf32, #tpu.memory_space<vmem>>, %arg8: memref<32x32xf32, #tpu.memory_space<vmem>>) attributes {dimension_semantics = [#tpu.dimension_semantics<parallel>], iteration_bounds = array<i64: 1>, scalar_prefetch = 0 : i64, scratch_operands = 0 : i64, tpu.core_type = #tpu.core_type<tc>, window_params = [{transform_indices = @transform_0, window_bounds = array<i64: 32, 32>}, {pipeline_mode = #tpu.pipeline_mode<synchronous>, transform_indices = @transform_1, window_bounds = array<i64: 1, 32>}, {pipeline_mode = #tpu.pipeline_mode<synchronous>, transform_indices = @transform_2, window_bounds = array<i64: 1, 32>}, {pipeline_mode = #tpu.pipeline_mode<synchronous>, transform_indices = @transform_3, window_bounds = array<i64: 32, 64>}, {pipeline_mode = #tpu.pipeline_mode<synchronous>, transform_indices = @transform_4, window_bounds = array<i64: 1, 64>}, {pipeline_mode = #tpu.pipeline_mode<synchronous>, transform_indices = @transform_5, window_bounds = array<i64: 64, 32>}, {pipeline_mode = #tpu.pipeline_mode<synchronous>, transform_indices = @transform_6, window_bounds = array<i64: 1, 32>}, {transform_indices = @transform_7, window_bounds = array<i64: 32, 32>}]} {
    %c0 = arith.constant 0 : index
    %c0_0 = arith.constant 0 : index
    %0 = vector.load %arg1[%c0, %c0_0] : memref<32x32xf32, #tpu.memory_space<vmem>>, vector<32x32xf32>
    %c0_1 = arith.constant 0 : index
    %c0_2 = arith.constant 0 : index
    %1 = vector.load %arg2[%c0_1, %c0_2] : memref<1x32xf32, #tpu.memory_space<vmem>>, vector<1x32xf32>
    %c0_3 = arith.constant 0 : index
    %c0_4 = arith.constant 0 : index
    %2 = vector.load %arg3[%c0_3, %c0_4] : memref<1x32xf32, #tpu.memory_space<vmem>>, vector<1x32xf32>
    %cst = arith.constant dense<0.000000e+00> : vector<32xf32>
    %3 = vector.multi_reduction <add>, %0, %cst [1] : vector<32x32xf32> to vector<32xf32>
    %4 = vector.shape_cast %3 : vector<32xf32> to vector<32x1xf32>
    %cst_5 = arith.constant 3.200000e+01 : f32
    %5 = vector.broadcast %cst_5 : f32 to vector<32x1xf32>
    %6 = arith.divf %4, %5 : vector<32x1xf32>
    %7 = vector.broadcast %6 : vector<32x1xf32> to vector<32x32xf32>
    %8 = arith.subf %0, %7 : vector<32x32xf32>
    %9 = arith.mulf %8, %8 : vector<32x32xf32>
    %cst_6 = arith.constant dense<0.000000e+00> : vector<32xf32>
    %10 = vector.multi_reduction <add>, %9, %cst_6 [1] : vector<32x32xf32> to vector<32xf32>
    %11 = vector.shape_cast %10 : vector<32xf32> to vector<32x1xf32>
    %cst_7 = arith.constant 3.200000e+01 : f32
    %12 = vector.broadcast %cst_7 : f32 to vector<32x1xf32>
    %13 = arith.divf %11, %12 : vector<32x1xf32>
    %14 = vector.broadcast %6 : vector<32x1xf32> to vector<32x32xf32>
    %15 = arith.subf %0, %14 : vector<32x32xf32>
    %cst_8 = arith.constant 9.99999974E-6 : f32
    %16 = vector.broadcast %cst_8 : f32 to vector<32x1xf32>
    %17 = arith.addf %13, %16 : vector<32x1xf32>
    %18 = math.rsqrt %17 : vector<32x1xf32>
    %19 = vector.broadcast %18 : vector<32x1xf32> to vector<32x32xf32>
    %20 = arith.mulf %15, %19 : vector<32x32xf32>
    %21 = vector.broadcast %1 : vector<1x32xf32> to vector<32x32xf32>
    %22 = arith.mulf %20, %21 : vector<32x32xf32>
    %23 = vector.broadcast %2 : vector<1x32xf32> to vector<32x32xf32>
    %24 = arith.addf %22, %23 : vector<32x32xf32>
    %25 = arith.truncf %24 : vector<32x32xf32> to vector<32x32xbf16>
    %c0_9 = arith.constant 0 : index
    %c0_10 = arith.constant 0 : index
    %26 = vector.load %arg4[%c0_9, %c0_10] : memref<32x64xbf16, #tpu.memory_space<vmem>>, vector<32x64xbf16>
    %cst_11 = arith.constant dense<0.000000e+00> : vector<32x64xf32>
    %27 = tpu.matmul %25, %26, %cst_11 {dimension_numbers = #tpu.dot_dimension_numbers<[1], [0], [0], [1], [0, 0, 1, 1], [], []>} : vector<32x32xbf16>, vector<32x64xbf16>, vector<32x64xf32> -> vector<32x64xf32>
    %c0_12 = arith.constant 0 : index
    %c0_13 = arith.constant 0 : index
    %28 = vector.load %arg5[%c0_12, %c0_13] : memref<1x64xf32, #tpu.memory_space<vmem>>, vector<1x64xf32>
    %29 = vector.broadcast %28 : vector<1x64xf32> to vector<32x64xf32>
    %30 = arith.addf %27, %29 : vector<32x64xf32>
    %cst_14 = arith.constant 5.000000e-01 : f32
    %31 = vector.broadcast %cst_14 : f32 to vector<32x64xf32>
    %32 = arith.mulf %31, %30 : vector<32x64xf32>
    %cst_15 = arith.constant 4.471500e-02 : f32
    %33 = vector.broadcast %cst_15 : f32 to vector<32x64xf32>
    %34 = arith.mulf %33, %30 : vector<32x64xf32>
    %35 = arith.mulf %34, %30 : vector<32x64xf32>
    %36 = arith.mulf %35, %30 : vector<32x64xf32>
    %37 = arith.addf %30, %36 : vector<32x64xf32>
    %cst_16 = arith.constant 0.797884583 : f32
    %38 = vector.broadcast %cst_16 : f32 to vector<32x64xf32>
    %39 = arith.mulf %38, %37 : vector<32x64xf32>
    %40 = math.tanh %39 : vector<32x64xf32>
    %cst_17 = arith.constant 1.000000e+00 : f32
    %41 = vector.broadcast %cst_17 : f32 to vector<32x64xf32>
    %42 = arith.addf %41, %40 : vector<32x64xf32>
    %43 = arith.mulf %32, %42 : vector<32x64xf32>
    %44 = arith.truncf %43 : vector<32x64xf32> to vector<32x64xbf16>
    %c0_18 = arith.constant 0 : index
    %c0_19 = arith.constant 0 : index
    %45 = vector.load %arg6[%c0_18, %c0_19] : memref<64x32xbf16, #tpu.memory_space<vmem>>, vector<64x32xbf16>
    %cst_20 = arith.constant dense<0.000000e+00> : vector<32x32xf32>
    %46 = tpu.matmul %44, %45, %cst_20 {dimension_numbers = #tpu.dot_dimension_numbers<[1], [0], [0], [1], [0, 0, 1, 1], [], []>} : vector<32x64xbf16>, vector<64x32xbf16>, vector<32x32xf32> -> vector<32x32xf32>
    %c0_21 = arith.constant 0 : index
    %c0_22 = arith.constant 0 : index
    %47 = vector.load %arg7[%c0_21, %c0_22] : memref<1x32xf32, #tpu.memory_space<vmem>>, vector<1x32xf32>
    %48 = vector.broadcast %47 : vector<1x32xf32> to vector<32x32xf32>
    %49 = arith.addf %46, %48 : vector<32x32xf32>
    %50 = arith.addf %0, %49 : vector<32x32xf32>
    %c0_23 = arith.constant 0 : index
    %c0_24 = arith.constant 0 : index
    %51 = vector.load %arg8[%c0_23, %c0_24] : memref<32x32xf32, #tpu.memory_space<vmem>>, vector<32x32xf32>
    tpu.vector_store %arg8[%c0_23, %c0_24], %50 {strides = array<i32>} : memref<32x32xf32, #tpu.memory_space<vmem>>, vector<32x32xf32>,
    return
  }
  func.func @transform_0(%arg0: i32) -> (i32, i32) {
    %c0_i32 = arith.constant 0 : i32
    %c0_i32_0 = arith.constant 0 : i32
    return %arg0, %c0_i32 : i32, i32
  }
  func.func @transform_1(%arg0: i32) -> (i32, i32) {
    %c0_i32 = arith.constant 0 : i32
    %c0_i32_0 = arith.constant 0 : i32
    %c0_i32_1 = arith.constant 0 : i32
    return %c0_i32, %c0_i32_0 : i32, i32
  }
  func.func @transform_2(%arg0: i32) -> (i32, i32) {
    %c0_i32 = arith.constant 0 : i32
    %c0_i32_0 = arith.constant 0 : i32
    %c0_i32_1 = arith.constant 0 : i32
    return %c0_i32, %c0_i32_0 : i32, i32
  }
  func.func @transform_3(%arg0: i32) -> (i32, i32) {
    %c0_i32 = arith.constant 0 : i32
    %c0_i32_0 = arith.constant 0 : i32
    %c0_i32_1 = arith.constant 0 : i32
    return %c0_i32, %c0_i32_0 : i32, i32
  }
  func.func @transform_4(%arg0: i32) -> (i32, i32) {
    %c0_i32 = arith.constant 0 : i32
    %c0_i32_0 = arith.constant 0 : i32
    %c0_i32_1 = arith.constant 0 : i32
    return %c0_i32, %c0_i32_0 : i32, i32
  }
  func.func @transform_5(%arg0: i32) -> (i32, i32) {
    %c0_i32 = arith.constant 0 : i32
    %c0_i32_0 = arith.constant 0 : i32
    %c0_i32_1 = arith.constant 0 : i32
    return %c0_i32, %c0_i32_0 : i32, i32
  }
  func.func @transform_6(%arg0: i32) -> (i32, i32) {
    %c0_i32 = arith.constant 0 : i32
    %c0_i32_0 = arith.constant 0 : i32
    %c0_i32_1 = arith.constant 0 : i32
    return %c0_i32, %c0_i32_0 : i32, i32
  }
  func.func @transform_7(%arg0: i32) -> (i32, i32) {
    %c0_i32 = arith.constant 0 : i32
    %c0_i32_0 = arith.constant 0 : i32
    return %arg0, %c0_i32 : i32, i32
  }
}

module attributes {stable_mosaic.version = 11 : i64} {
  func.func @_self_attn_kernel(%arg0: i32, %arg1: i32, %arg2: memref<1x16x32xf32, #tpu.memory_space<vmem>>, %arg3: memref<1x1x16xi32, #tpu.memory_space<vmem>>, %arg4: memref<1x32xf32, #tpu.memory_space<vmem>>, %arg5: memref<1x32xf32, #tpu.memory_space<vmem>>, %arg6: memref<32x32xbf16, #tpu.memory_space<vmem>>, %arg7: memref<1x32xf32, #tpu.memory_space<vmem>>, %arg8: memref<32x64xbf16, #tpu.memory_space<vmem>>, %arg9: memref<1x64xf32, #tpu.memory_space<vmem>>, %arg10: memref<32x32xbf16, #tpu.memory_space<vmem>>, %arg11: memref<1x32xf32, #tpu.memory_space<vmem>>, %arg12: memref<1x16x32xf32, #tpu.memory_space<vmem>>, %arg13: memref<4x16x8xbf16, #tpu.memory_space<vmem>>, %arg14: memref<4x16x8xbf16, #tpu.memory_space<vmem>>, %arg15: memref<4x16x8xbf16, #tpu.memory_space<vmem>>, %arg16: memref<4x16x8xbf16, #tpu.memory_space<vmem>>) attributes {dimension_semantics = [#tpu.dimension_semantics<parallel>, #tpu.dimension_semantics<parallel>], iteration_bounds = array<i64: 2, 1>, scalar_prefetch = 0 : i64, scratch_operands = 4 : i64, tpu.core_type = #tpu.core_type<tc>, window_params = [{transform_indices = @transform_0, window_bounds = array<i64: 1, 16, 32>}, {transform_indices = @transform_1, window_bounds = array<i64: 1, 1, 16>}, {pipeline_mode = #tpu.pipeline_mode<synchronous>, transform_indices = @transform_2, window_bounds = array<i64: 1, 32>}, {pipeline_mode = #tpu.pipeline_mode<synchronous>, transform_indices = @transform_3, window_bounds = array<i64: 1, 32>}, {pipeline_mode = #tpu.pipeline_mode<synchronous>, transform_indices = @transform_4, window_bounds = array<i64: 32, 32>}, {pipeline_mode = #tpu.pipeline_mode<synchronous>, transform_indices = @transform_5, window_bounds = array<i64: 1, 32>}, {pipeline_mode = #tpu.pipeline_mode<synchronous>, transform_indices = @transform_6, window_bounds = array<i64: 32, 64>}, {pipeline_mode = #tpu.pipeline_mode<synchronous>, transform_indices = @transform_7, window_bounds = array<i64: 1, 64>}, {pipeline_mode = #tpu.pipeline_mode<synchronous>, transform_indices = @transform_8, window_bounds = array<i64: 32, 32>}, {pipeline_mode = #tpu.pipeline_mode<synchronous>, transform_indices = @transform_9, window_bounds = array<i64: 1, 32>}, {transform_indices = @transform_10, window_bounds = array<i64: 1, 16, 32>}]} {
    %c16_i32 = arith.constant 16 : i32
    %0 = arith.muli %arg1, %c16_i32 : i32
    %1 = tpu.assume_multiple %0, 16 : i32
    %c0 = arith.constant 0 : index
    %c0_0 = arith.constant 0 : index
    %c0_1 = arith.constant 0 : index
    %2 = vector.load %arg2[%c0, %c0_0, %c0_1] : memref<1x16x32xf32, #tpu.memory_space<vmem>>, vector<1x16x32xf32>
    %3 = vector.shape_cast %2 : vector<1x16x32xf32> to vector<16x32xf32>
    %c0_2 = arith.constant 0 : index
    %c0_3 = arith.constant 0 : index
    %4 = vector.load %arg4[%c0_2, %c0_3] : memref<1x32xf32, #tpu.memory_space<vmem>>, vector<1x32xf32>
    %c0_4 = arith.constant 0 : index
    %c0_5 = arith.constant 0 : index
    %5 = vector.load %arg5[%c0_4, %c0_5] : memref<1x32xf32, #tpu.memory_space<vmem>>, vector<1x32xf32>
    %cst = arith.constant dense<0.000000e+00> : vector<16xf32>
    %6 = vector.multi_reduction <add>, %3, %cst [1] : vector<16x32xf32> to vector<16xf32>
    %7 = vector.shape_cast %6 : vector<16xf32> to vector<16x1xf32>
    %cst_6 = arith.constant 3.200000e+01 : f32
    %8 = vector.broadcast %cst_6 : f32 to vector<16x1xf32>
    %9 = arith.divf %7, %8 : vector<16x1xf32>
    %10 = vector.broadcast %9 : vector<16x1xf32> to vector<16x32xf32>
    %11 = arith.subf %3, %10 : vector<16x32xf32>
    %12 = arith.mulf %11, %11 : vector<16x32xf32>
    %cst_7 = arith.constant dense<0.000000e+00> : vector<16xf32>
    %13 = vector.multi_reduction <add>, %12, %cst_7 [1] : vector<16x32xf32> to vector<16xf32>
    %14 = vector.shape_cast %13 : vector<16xf32> to vector<16x1xf32>
    %cst_8 = arith.constant 3.200000e+01 : f32
    %15 = vector.broadcast %cst_8 : f32 to vector<16x1xf32>
    %16 = arith.divf %14, %15 : vector<16x1xf32>
    %17 = vector.broadcast %9 : vector<16x1xf32> to vector<16x32xf32>
    %18 = arith.subf %3, %17 : vector<16x32xf32>
    %cst_9 = arith.constant 9.99999974E-6 : f32
    %19 = vector.broadcast %cst_9 : f32 to vector<16x1xf32>
    %20 = arith.addf %16, %19 : vector<16x1xf32>
    %21 = math.rsqrt %20 : vector<16x1xf32>
    %22 = vector.broadcast %21 : vector<16x1xf32> to vector<16x32xf32>
    %23 = arith.mulf %18, %22 : vector<16x32xf32>
    %24 = vector.broadcast %4 : vector<1x32xf32> to vector<16x32xf32>
    %25 = arith.mulf %23, %24 : vector<16x32xf32>
    %26 = vector.broadcast %5 : vector<1x32xf32> to vector<16x32xf32>
    %27 = arith.addf %25, %26 : vector<16x32xf32>
    %28 = arith.truncf %27 : vector<16x32xf32> to vector<16x32xbf16>
    %c0_10 = arith.constant 0 : index
    %c0_11 = arith.constant 0 : index
    %29 = vector.load %arg8[%c0_10, %c0_11] : memref<32x64xbf16, #tpu.memory_space<vmem>>, vector<32x64xbf16>
    %cst_12 = arith.constant dense<0.000000e+00> : vector<16x64xf32>
    %30 = tpu.matmul %28, %29, %cst_12 {dimension_numbers = #tpu.dot_dimension_numbers<[1], [0], [0], [1], [0, 0, 1, 1], [], []>} : vector<16x32xbf16>, vector<32x64xbf16>, vector<16x64xf32> -> vector<16x64xf32>
    %c0_13 = arith.constant 0 : index
    %c0_14 = arith.constant 0 : index
    %31 = vector.load %arg9[%c0_13, %c0_14] : memref<1x64xf32, #tpu.memory_space<vmem>>, vector<1x64xf32>
    %32 = vector.broadcast %31 : vector<1x64xf32> to vector<16x64xf32>
    %33 = arith.addf %30, %32 : vector<16x64xf32>
    %c0_15 = arith.constant 0 : index
    %34 = arith.index_cast %1 : i32 to index
    %c0_16 = arith.constant 0 : index
    %35 = vector.load %arg2[%c0_15, %34, %c0_16] : memref<1x16x32xf32, #tpu.memory_space<vmem>>, vector<1x16x32xf32>
    %36 = vector.shape_cast %35 : vector<1x16x32xf32> to vector<16x32xf32>
    %c0_17 = arith.constant 0 : index
    %c0_18 = arith.constant 0 : index
    %37 = vector.load %arg4[%c0_17, %c0_18] : memref<1x32xf32, #tpu.memory_space<vmem>>, vector<1x32xf32>
    %c0_19 = arith.constant 0 : index
    %c0_20 = arith.constant 0 : index
    %38 = vector.load %arg5[%c0_19, %c0_20] : memref<1x32xf32, #tpu.memory_space<vmem>>, vector<1x32xf32>
    %cst_21 = arith.constant dense<0.000000e+00> : vector<16xf32>
    %39 = vector.multi_reduction <add>, %36, %cst_21 [1] : vector<16x32xf32> to vector<16xf32>
    %40 = vector.shape_cast %39 : vector<16xf32> to vector<16x1xf32>
    %cst_22 = arith.constant 3.200000e+01 : f32
    %41 = vector.broadcast %cst_22 : f32 to vector<16x1xf32>
    %42 = arith.divf %40, %41 : vector<16x1xf32>
    %43 = vector.broadcast %42 : vector<16x1xf32> to vector<16x32xf32>
    %44 = arith.subf %36, %43 : vector<16x32xf32>
    %45 = arith.mulf %44, %44 : vector<16x32xf32>
    %cst_23 = arith.constant dense<0.000000e+00> : vector<16xf32>
    %46 = vector.multi_reduction <add>, %45, %cst_23 [1] : vector<16x32xf32> to vector<16xf32>
    %47 = vector.shape_cast %46 : vector<16xf32> to vector<16x1xf32>
    %cst_24 = arith.constant 3.200000e+01 : f32
    %48 = vector.broadcast %cst_24 : f32 to vector<16x1xf32>
    %49 = arith.divf %47, %48 : vector<16x1xf32>
    %50 = vector.broadcast %42 : vector<16x1xf32> to vector<16x32xf32>
    %51 = arith.subf %36, %50 : vector<16x32xf32>
    %cst_25 = arith.constant 9.99999974E-6 : f32
    %52 = vector.broadcast %cst_25 : f32 to vector<16x1xf32>
    %53 = arith.addf %49, %52 : vector<16x1xf32>
    %54 = math.rsqrt %53 : vector<16x1xf32>
    %55 = vector.broadcast %54 : vector<16x1xf32> to vector<16x32xf32>
    %56 = arith.mulf %51, %55 : vector<16x32xf32>
    %57 = vector.broadcast %37 : vector<1x32xf32> to vector<16x32xf32>
    %58 = arith.mulf %56, %57 : vector<16x32xf32>
    %59 = vector.broadcast %38 : vector<1x32xf32> to vector<16x32xf32>
    %60 = arith.addf %58, %59 : vector<16x32xf32>
    %61 = arith.truncf %60 : vector<16x32xf32> to vector<16x32xbf16>
    %c0_26 = arith.constant 0 : index
    %c0_27 = arith.constant 0 : index
    %62 = vector.load %arg6[%c0_26, %c0_27] : memref<32x32xbf16, #tpu.memory_space<vmem>>, vector<32x32xbf16>
    %cst_28 = arith.constant dense<0.000000e+00> : vector<16x32xf32>
    %63 = tpu.matmul %61, %62, %cst_28 {dimension_numbers = #tpu.dot_dimension_numbers<[1], [0], [0], [1], [0, 0, 1, 1], [], []>} : vector<16x32xbf16>, vector<32x32xbf16>, vector<16x32xf32> -> vector<16x32xf32>
    %c0_29 = arith.constant 0 : index
    %c0_30 = arith.constant 0 : index
    %64 = vector.load %arg7[%c0_29, %c0_30] : memref<1x32xf32, #tpu.memory_space<vmem>>, vector<1x32xf32>
    %65 = vector.broadcast %64 : vector<1x32xf32> to vector<16x32xf32>
    %66 = arith.addf %63, %65 : vector<16x32xf32>
    %67 = vector.extract_strided_slice %66 {offsets = [0, 0], sizes = [16, 8], strides = [1, 1]} : vector<16x32xf32> to vector<16x8xf32>
    %68 = arith.truncf %67 : vector<16x8xf32> to vector<16x8xbf16>
    %c0_31 = arith.constant 0 : index
    %c0_32 = arith.constant 0 : index
    %c0_33 = arith.constant 0 : index
    %69 = vector.load %arg13[%c0_31, %c0_32, %c0_33] : memref<4x16x8xbf16, #tpu.memory_space<vmem>>, vector<1x16x8xbf16>
    %70 = vector.shape_cast %69 : vector<1x16x8xbf16> to vector<16x8xbf16>
    %71 = vector.shape_cast %68 : vector<16x8xbf16> to vector<1x16x8xbf16>
    tpu.vector_store %arg13[%c0_31, %c0_32, %c0_33], %71 {strides = array<i32>} : memref<4x16x8xbf16, #tpu.memory_space<vmem>>, vector<1x16x8xbf16>,
    %72 = vector.extract_strided_slice %33 {offsets = [0, 0], sizes = [16, 8], strides = [1, 1]} : vector<16x64xf32> to vector<16x8xf32>
    %73 = arith.truncf %72 : vector<16x8xf32> to vector<16x8xbf16>
    %c0_34 = arith.constant 0 : index
    %c0_35 = arith.constant 0 : index
    %c0_36 = arith.constant 0 : index
    %74 = vector.load %arg14[%c0_34, %c0_35, %c0_36] : memref<4x16x8xbf16, #tpu.memory_space<vmem>>, vector<1x16x8xbf16>
    %75 = vector.shape_cast %74 : vector<1x16x8xbf16> to vector<16x8xbf16>
    %76 = vector.shape_cast %73 : vector<16x8xbf16> to vector<1x16x8xbf16>
    tpu.vector_store %arg14[%c0_34, %c0_35, %c0_36], %76 {strides = array<i32>} : memref<4x16x8xbf16, #tpu.memory_space<vmem>>, vector<1x16x8xbf16>,
    %77 = vector.extract_strided_slice %33 {offsets = [0, 32], sizes = [16, 8], strides = [1, 1]} : vector<16x64xf32> to vector<16x8xf32>
    %78 = arith.truncf %77 : vector<16x8xf32> to vector<16x8xbf16>
    %c0_37 = arith.constant 0 : index
    %c0_38 = arith.constant 0 : index
    %c0_39 = arith.constant 0 : index
    %79 = vector.load %arg15[%c0_37, %c0_38, %c0_39] : memref<4x16x8xbf16, #tpu.memory_space<vmem>>, vector<1x16x8xbf16>
    %80 = vector.shape_cast %79 : vector<1x16x8xbf16> to vector<16x8xbf16>
    %81 = vector.shape_cast %78 : vector<16x8xbf16> to vector<1x16x8xbf16>
    tpu.vector_store %arg15[%c0_37, %c0_38, %c0_39], %81 {strides = array<i32>} : memref<4x16x8xbf16, #tpu.memory_space<vmem>>, vector<1x16x8xbf16>,
    %82 = vector.extract_strided_slice %66 {offsets = [0, 8], sizes = [16, 8], strides = [1, 1]} : vector<16x32xf32> to vector<16x8xf32>
    %83 = arith.truncf %82 : vector<16x8xf32> to vector<16x8xbf16>
    %c1 = arith.constant 1 : index
    %c0_40 = arith.constant 0 : index
    %c0_41 = arith.constant 0 : index
    %84 = vector.load %arg13[%c1, %c0_40, %c0_41] : memref<4x16x8xbf16, #tpu.memory_space<vmem>>, vector<1x16x8xbf16>
    %85 = vector.shape_cast %84 : vector<1x16x8xbf16> to vector<16x8xbf16>
    %86 = vector.shape_cast %83 : vector<16x8xbf16> to vector<1x16x8xbf16>
    tpu.vector_store %arg13[%c1, %c0_40, %c0_41], %86 {strides = array<i32>} : memref<4x16x8xbf16, #tpu.memory_space<vmem>>, vector<1x16x8xbf16>,
    %87 = vector.extract_strided_slice %33 {offsets = [0, 8], sizes = [16, 8], strides = [1, 1]} : vector<16x64xf32> to vector<16x8xf32>
    %88 = arith.truncf %87 : vector<16x8xf32> to vector<16x8xbf16>
    %c1_42 = arith.constant 1 : index
    %c0_43 = arith.constant 0 : index
    %c0_44 = arith.constant 0 : index
    %89 = vector.load %arg14[%c1_42, %c0_43, %c0_44] : memref<4x16x8xbf16, #tpu.memory_space<vmem>>, vector<1x16x8xbf16>
    %90 = vector.shape_cast %89 : vector<1x16x8xbf16> to vector<16x8xbf16>
    %91 = vector.shape_cast %88 : vector<16x8xbf16> to vector<1x16x8xbf16>
    tpu.vector_store %arg14[%c1_42, %c0_43, %c0_44], %91 {strides = array<i32>} : memref<4x16x8xbf16, #tpu.memory_space<vmem>>, vector<1x16x8xbf16>,
    %92 = vector.extract_strided_slice %33 {offsets = [0, 40], sizes = [16, 8], strides = [1, 1]} : vector<16x64xf32> to vector<16x8xf32>
    %93 = arith.truncf %92 : vector<16x8xf32> to vector<16x8xbf16>
    %c1_45 = arith.constant 1 : index
    %c0_46 = arith.constant 0 : index
    %c0_47 = arith.constant 0 : index
    %94 = vector.load %arg15[%c1_45, %c0_46, %c0_47] : memref<4x16x8xbf16, #tpu.memory_space<vmem>>, vector<1x16x8xbf16>
    %95 = vector.shape_cast %94 : vector<1x16x8xbf16> to vector<16x8xbf16>
    %96 = vector.shape_cast %93 : vector<16x8xbf16> to vector<1x16x8xbf16>
    tpu.vector_store %arg15[%c1_45, %c0_46, %c0_47], %96 {strides = array<i32>} : memref<4x16x8xbf16, #tpu.memory_space<vmem>>, vector<1x16x8xbf16>,
    %97 = vector.extract_strided_slice %66 {offsets = [0, 16], sizes = [16, 8], strides = [1, 1]} : vector<16x32xf32> to vector<16x8xf32>
    %98 = arith.truncf %97 : vector<16x8xf32> to vector<16x8xbf16>
    %c2 = arith.constant 2 : index
    %c0_48 = arith.constant 0 : index
    %c0_49 = arith.constant 0 : index
    %99 = vector.load %arg13[%c2, %c0_48, %c0_49] : memref<4x16x8xbf16, #tpu.memory_space<vmem>>, vector<1x16x8xbf16>
    %100 = vector.shape_cast %99 : vector<1x16x8xbf16> to vector<16x8xbf16>
    %101 = vector.shape_cast %98 : vector<16x8xbf16> to vector<1x16x8xbf16>
    tpu.vector_store %arg13[%c2, %c0_48, %c0_49], %101 {strides = array<i32>} : memref<4x16x8xbf16, #tpu.memory_space<vmem>>, vector<1x16x8xbf16>,
    %102 = vector.extract_strided_slice %33 {offsets = [0, 16], sizes = [16, 8], strides = [1, 1]} : vector<16x64xf32> to vector<16x8xf32>
    %103 = arith.truncf %102 : vector<16x8xf32> to vector<16x8xbf16>
    %c2_50 = arith.constant 2 : index
    %c0_51 = arith.constant 0 : index
    %c0_52 = arith.constant 0 : index
    %104 = vector.load %arg14[%c2_50, %c0_51, %c0_52] : memref<4x16x8xbf16, #tpu.memory_space<vmem>>, vector<1x16x8xbf16>
    %105 = vector.shape_cast %104 : vector<1x16x8xbf16> to vector<16x8xbf16>
    %106 = vector.shape_cast %103 : vector<16x8xbf16> to vector<1x16x8xbf16>
    tpu.vector_store %arg14[%c2_50, %c0_51, %c0_52], %106 {strides = array<i32>} : memref<4x16x8xbf16, #tpu.memory_space<vmem>>, vector<1x16x8xbf16>,
    %107 = vector.extract_strided_slice %33 {offsets = [0, 48], sizes = [16, 8], strides = [1, 1]} : vector<16x64xf32> to vector<16x8xf32>
    %108 = arith.truncf %107 : vector<16x8xf32> to vector<16x8xbf16>
    %c2_53 = arith.constant 2 : index
    %c0_54 = arith.constant 0 : index
    %c0_55 = arith.constant 0 : index
    %109 = vector.load %arg15[%c2_53, %c0_54, %c0_55] : memref<4x16x8xbf16, #tpu.memory_space<vmem>>, vector<1x16x8xbf16>
    %110 = vector.shape_cast %109 : vector<1x16x8xbf16> to vector<16x8xbf16>
    %111 = vector.shape_cast %108 : vector<16x8xbf16> to vector<1x16x8xbf16>
    tpu.vector_store %arg15[%c2_53, %c0_54, %c0_55], %111 {strides = array<i32>} : memref<4x16x8xbf16, #tpu.memory_space<vmem>>, vector<1x16x8xbf16>,
    %112 = vector.extract_strided_slice %66 {offsets = [0, 24], sizes = [16, 8], strides = [1, 1]} : vector<16x32xf32> to vector<16x8xf32>
    %113 = arith.truncf %112 : vector<16x8xf32> to vector<16x8xbf16>
    %c3 = arith.constant 3 : index
    %c0_56 = arith.constant 0 : index
    %c0_57 = arith.constant 0 : index
    %114 = vector.load %arg13[%c3, %c0_56, %c0_57] : memref<4x16x8xbf16, #tpu.memory_space<vmem>>, vector<1x16x8xbf16>
    %115 = vector.shape_cast %114 : vector<1x16x8xbf16> to vector<16x8xbf16>
    %116 = vector.shape_cast %113 : vector<16x8xbf16> to vector<1x16x8xbf16>
    tpu.vector_store %arg13[%c3, %c0_56, %c0_57], %116 {strides = array<i32>} : memref<4x16x8xbf16, #tpu.memory_space<vmem>>, vector<1x16x8xbf16>,
    %117 = vector.extract_strided_slice %33 {offsets = [0, 24], sizes = [16, 8], strides = [1, 1]} : vector<16x64xf32> to vector<16x8xf32>
    %118 = arith.truncf %117 : vector<16x8xf32> to vector<16x8xbf16>
    %c3_58 = arith.constant 3 : index
    %c0_59 = arith.constant 0 : index
    %c0_60 = arith.constant 0 : index
    %119 = vector.load %arg14[%c3_58, %c0_59, %c0_60] : memref<4x16x8xbf16, #tpu.memory_space<vmem>>, vector<1x16x8xbf16>
    %120 = vector.shape_cast %119 : vector<1x16x8xbf16> to vector<16x8xbf16>
    %121 = vector.shape_cast %118 : vector<16x8xbf16> to vector<1x16x8xbf16>
    tpu.vector_store %arg14[%c3_58, %c0_59, %c0_60], %121 {strides = array<i32>} : memref<4x16x8xbf16, #tpu.memory_space<vmem>>, vector<1x16x8xbf16>,
    %122 = vector.extract_strided_slice %33 {offsets = [0, 56], sizes = [16, 8], strides = [1, 1]} : vector<16x64xf32> to vector<16x8xf32>
    %123 = arith.truncf %122 : vector<16x8xf32> to vector<16x8xbf16>
    %c3_61 = arith.constant 3 : index
    %c0_62 = arith.constant 0 : index
    %c0_63 = arith.constant 0 : index
    %124 = vector.load %arg15[%c3_61, %c0_62, %c0_63] : memref<4x16x8xbf16, #tpu.memory_space<vmem>>, vector<1x16x8xbf16>
    %125 = vector.shape_cast %124 : vector<1x16x8xbf16> to vector<16x8xbf16>
    %126 = vector.shape_cast %123 : vector<16x8xbf16> to vector<1x16x8xbf16>
    tpu.vector_store %arg15[%c3_61, %c0_62, %c0_63], %126 {strides = array<i32>} : memref<4x16x8xbf16, #tpu.memory_space<vmem>>, vector<1x16x8xbf16>,
    %127 = tpu.iota {dimensions = array<i32: 0>} : vector<16x16xi32>
    %128 = vector.broadcast %1 : i32 to vector<16x16xi32>
    %129 = arith.addi %128, %127 : vector<16x16xi32>
    %130 = tpu.iota {dimensions = array<i32: 1>} : vector<16x16xi32>
    %131 = arith.cmpi sle, %130, %129 : vector<16x16xi32>
    %c0_64 = arith.constant 0 : index
    %c0_65 = arith.constant 0 : index
    %c0_66 = arith.constant 0 : index
    %132 = vector.load %arg3[%c0_64, %c0_65, %c0_66] : memref<1x1x16xi32, #tpu.memory_space<vmem>>, vector<1x1x16xi32>
    %133 = vector.shape_cast %132 : vector<1x1x16xi32> to vector<1x16xi32>
    %c0_i32 = arith.constant 0 : i32
    %134 = vector.broadcast %c0_i32 : i32 to vector<1x16xi32>
    %135 = arith.cmpi sgt, %133, %134 : vector<1x16xi32>
    %136 = vector.broadcast %135 : vector<1x16xi1> to vector<16x16xi1>
    %137 = arith.andi %131, %136 : vector<16x16xi1>
    %c0_i32_67 = arith.constant 0 : i32
    %c4_i32 = arith.constant 4 : i32
    %138 = arith.addi %c0_i32_67, %c4_i32 : i32
    %c1_i32 = arith.constant 1 : i32
    scf.for %arg17 = %c0_i32_67 to %138 step %c1_i32  : i32 {
      %157 = arith.index_cast %arg17 : i32 to index
      %c0_89 = arith.constant 0 : index
      %c0_90 = arith.constant 0 : index
      %158 = vector.load %arg13[%157, %c0_89, %c0_90] : memref<4x16x8xbf16, #tpu.memory_space<vmem>>, vector<1x16x8xbf16>
      %159 = vector.shape_cast %158 : vector<1x16x8xbf16> to vector<16x8xbf16>
      %160 = arith.index_cast %arg17 : i32 to index
      %c0_91 = arith.constant 0 : index
      %c0_92 = arith.constant 0 : index
      %161 = vector.load %arg14[%160, %c0_91, %c0_92] : memref<4x16x8xbf16, #tpu.memory_space<vmem>>, vector<1x16x8xbf16>
      %162 = vector.shape_cast %161 : vector<1x16x8xbf16> to vector<16x8xbf16>
      %cst_93 = arith.constant dense<0.000000e+00> : vector<16x16xf32>
      %163 = tpu.matmul %159, %162, %cst_93 {dimension_numbers = #tpu.dot_dimension_numbers<[1], [1], [0], [0], [0, 0, 1, 0], [], []>} : vector<16x8xbf16>, vector<16x8xbf16>, vector<16x16xf32> -> vector<16x16xf32>
      %cst_94 = arith.constant -1.000000e+09 : f32
      %164 = vector.broadcast %cst_94 : f32 to vector<16x16xf32>
      %165 = arith.select %137, %163, %164 : vector<16x16xi1>, vector<16x16xf32>
      %cst_95 = arith.constant dense<0xFF800000> : vector<16xf32>
      %166 = vector.multi_reduction <maximumf>, %165, %cst_95 [1] : vector<16x16xf32> to vector<16xf32>
      %167 = vector.shape_cast %166 : vector<16xf32> to vector<16x1xf32>
      %168 = vector.broadcast %167 : vector<16x1xf32> to vector<16x16xf32>
      %169 = arith.subf %165, %168 : vector<16x16xf32>
      %170 = math.exp %169 : vector<16x16xf32>
      %cst_96 = arith.constant dense<0.000000e+00> : vector<16xf32>
      %171 = vector.multi_reduction <add>, %170, %cst_96 [1] : vector<16x16xf32> to vector<16xf32>
      %172 = vector.shape_cast %171 : vector<16xf32> to vector<16x1xf32>
      %173 = tpu.reciprocal %172 {approx = true} : vector<16x1xf32> -> vector<16x1xf32>
      %174 = vector.broadcast %173 : vector<16x1xf32> to vector<16x16xf32>
      %175 = arith.mulf %170, %174 : vector<16x16xf32>
      %176 = arith.truncf %175 : vector<16x16xf32> to vector<16x16xbf16>
      %177 = arith.index_cast %arg17 : i32 to index
      %c0_97 = arith.constant 0 : index
      %c0_98 = arith.constant 0 : index
      %178 = vector.load %arg15[%177, %c0_97, %c0_98] : memref<4x16x8xbf16, #tpu.memory_space<vmem>>, vector<1x16x8xbf16>
      %179 = vector.shape_cast %178 : vector<1x16x8xbf16> to vector<16x8xbf16>
      %cst_99 = arith.constant dense<0.000000e+00> : vector<16x8xf32>
      %180 = tpu.matmul %176, %179, %cst_99 {dimension_numbers = #tpu.dot_dimension_numbers<[1], [0], [0], [1], [0, 0, 1, 1], [], []>} : vector<16x16xbf16>, vector<16x8xbf16>, vector<16x8xf32> -> vector<16x8xf32>
      %181 = arith.truncf %180 : vector<16x8xf32> to vector<16x8xbf16>
      %182 = arith.index_cast %arg17 : i32 to index
      %c0_100 = arith.constant 0 : index
      %c0_101 = arith.constant 0 : index
      %183 = vector.load %arg16[%182, %c0_100, %c0_101] : memref<4x16x8xbf16, #tpu.memory_space<vmem>>, vector<1x16x8xbf16>
      %184 = vector.shape_cast %183 : vector<1x16x8xbf16> to vector<16x8xbf16>
      %185 = vector.shape_cast %181 : vector<16x8xbf16> to vector<1x16x8xbf16>
      tpu.vector_store %arg16[%182, %c0_100, %c0_101], %185 {strides = array<i32>} : memref<4x16x8xbf16, #tpu.memory_space<vmem>>, vector<1x16x8xbf16>,
    }
    %c4_i32_68 = arith.constant 4 : i32
    %c0_69 = arith.constant 0 : index
    %c0_70 = arith.constant 0 : index
    %c0_71 = arith.constant 0 : index
    %139 = vector.load %arg16[%c0_69, %c0_70, %c0_71] : memref<4x16x8xbf16, #tpu.memory_space<vmem>>, vector<1x16x8xbf16>
    %140 = vector.shape_cast %139 : vector<1x16x8xbf16> to vector<16x8xbf16>
    %c1_72 = arith.constant 1 : index
    %c0_73 = arith.constant 0 : index
    %c0_74 = arith.constant 0 : index
    %141 = vector.load %arg16[%c1_72, %c0_73, %c0_74] : memref<4x16x8xbf16, #tpu.memory_space<vmem>>, vector<1x16x8xbf16>
    %142 = vector.shape_cast %141 : vector<1x16x8xbf16> to vector<16x8xbf16>
    %c2_75 = arith.constant 2 : index
    %c0_76 = arith.constant 0 : index
    %c0_77 = arith.constant 0 : index
    %143 = vector.load %arg16[%c2_75, %c0_76, %c0_77] : memref<4x16x8xbf16, #tpu.memory_space<vmem>>, vector<1x16x8xbf16>
    %144 = vector.shape_cast %143 : vector<1x16x8xbf16> to vector<16x8xbf16>
    %c3_78 = arith.constant 3 : index
    %c0_79 = arith.constant 0 : index
    %c0_80 = arith.constant 0 : index
    %145 = vector.load %arg16[%c3_78, %c0_79, %c0_80] : memref<4x16x8xbf16, #tpu.memory_space<vmem>>, vector<1x16x8xbf16>
    %146 = vector.shape_cast %145 : vector<1x16x8xbf16> to vector<16x8xbf16>
    %147 = tpu.concatenate %140, %142, %144, %146 in 1 : vector<16x8xbf16>, vector<16x8xbf16>, vector<16x8xbf16>, vector<16x8xbf16> -> vector<16x32xbf16>
    %c0_81 = arith.constant 0 : index
    %c0_82 = arith.constant 0 : index
    %148 = vector.load %arg10[%c0_81, %c0_82] : memref<32x32xbf16, #tpu.memory_space<vmem>>, vector<32x32xbf16>
    %cst_83 = arith.constant dense<0.000000e+00> : vector<16x32xf32>
    %149 = tpu.matmul %147, %148, %cst_83 {dimension_numbers = #tpu.dot_dimension_numbers<[1], [0], [0], [1], [0, 0, 1, 1], [], []>} : vector<16x32xbf16>, vector<32x32xbf16>, vector<16x32xf32> -> vector<16x32xf32>
    %c0_84 = arith.constant 0 : index
    %c0_85 = arith.constant 0 : index
    %150 = vector.load %arg11[%c0_84, %c0_85] : memref<1x32xf32, #tpu.memory_space<vmem>>, vector<1x32xf32>
    %151 = vector.broadcast %150 : vector<1x32xf32> to vector<16x32xf32>
    %152 = arith.addf %149, %151 : vector<16x32xf32>
    %153 = arith.addf %36, %152 : vector<16x32xf32>
    %c0_86 = arith.constant 0 : index
    %c0_87 = arith.constant 0 : index
    %c0_88 = arith.constant 0 : index
    %154 = vector.load %arg12[%c0_86, %c0_87, %c0_88] : memref<1x16x32xf32, #tpu.memory_space<vmem>>, vector<1x16x32xf32>
    %155 = vector.shape_cast %154 : vector<1x16x32xf32> to vector<16x32xf32>
    %156 = vector.shape_cast %153 : vector<16x32xf32> to vector<1x16x32xf32>
    tpu.vector_store %arg12[%c0_86, %c0_87, %c0_88], %156 {strides = array<i32>} : memref<1x16x32xf32, #tpu.memory_space<vmem>>, vector<1x16x32xf32>,
    return
  }
  func.func @transform_0(%arg0: i32, %arg1: i32) -> (i32, i32, i32) {
    %c0_i32 = arith.constant 0 : i32
    %c0_i32_0 = arith.constant 0 : i32
    %c0_i32_1 = arith.constant 0 : i32
    return %arg0, %c0_i32, %c0_i32_0 : i32, i32, i32
  }
  func.func @transform_1(%arg0: i32, %arg1: i32) -> (i32, i32, i32) {
    %c0_i32 = arith.constant 0 : i32
    %c0_i32_0 = arith.constant 0 : i32
    %c0_i32_1 = arith.constant 0 : i32
    return %arg0, %c0_i32, %c0_i32_0 : i32, i32, i32
  }
  func.func @transform_2(%arg0: i32, %arg1: i32) -> (i32, i32) {
    %c0_i32 = arith.constant 0 : i32
    %c0_i32_0 = arith.constant 0 : i32
    %c0_i32_1 = arith.constant 0 : i32
    return %c0_i32, %c0_i32_0 : i32, i32
  }
  func.func @transform_3(%arg0: i32, %arg1: i32) -> (i32, i32) {
    %c0_i32 = arith.constant 0 : i32
    %c0_i32_0 = arith.constant 0 : i32
    %c0_i32_1 = arith.constant 0 : i32
    return %c0_i32, %c0_i32_0 : i32, i32
  }
  func.func @transform_4(%arg0: i32, %arg1: i32) -> (i32, i32) {
    %c0_i32 = arith.constant 0 : i32
    %c0_i32_0 = arith.constant 0 : i32
    %c0_i32_1 = arith.constant 0 : i32
    return %c0_i32, %c0_i32_0 : i32, i32
  }
  func.func @transform_5(%arg0: i32, %arg1: i32) -> (i32, i32) {
    %c0_i32 = arith.constant 0 : i32
    %c0_i32_0 = arith.constant 0 : i32
    %c0_i32_1 = arith.constant 0 : i32
    return %c0_i32, %c0_i32_0 : i32, i32
  }
  func.func @transform_6(%arg0: i32, %arg1: i32) -> (i32, i32) {
    %c0_i32 = arith.constant 0 : i32
    %c0_i32_0 = arith.constant 0 : i32
    %c0_i32_1 = arith.constant 0 : i32
    return %c0_i32, %c0_i32_0 : i32, i32
  }
  func.func @transform_7(%arg0: i32, %arg1: i32) -> (i32, i32) {
    %c0_i32 = arith.constant 0 : i32
    %c0_i32_0 = arith.constant 0 : i32
    %c0_i32_1 = arith.constant 0 : i32
    return %c0_i32, %c0_i32_0 : i32, i32
  }
  func.func @transform_8(%arg0: i32, %arg1: i32) -> (i32, i32) {
    %c0_i32 = arith.constant 0 : i32
    %c0_i32_0 = arith.constant 0 : i32
    %c0_i32_1 = arith.constant 0 : i32
    return %c0_i32, %c0_i32_0 : i32, i32
  }
  func.func @transform_9(%arg0: i32, %arg1: i32) -> (i32, i32) {
    %c0_i32 = arith.constant 0 : i32
    %c0_i32_0 = arith.constant 0 : i32
    %c0_i32_1 = arith.constant 0 : i32
    return %c0_i32, %c0_i32_0 : i32, i32
  }
  func.func @transform_10(%arg0: i32, %arg1: i32) -> (i32, i32, i32) {
    %c0_i32 = arith.constant 0 : i32
    %c0_i32_0 = arith.constant 0 : i32
    return %arg0, %arg1, %c0_i32 : i32, i32, i32
  }
}

module attributes {stable_mosaic.version = 11 : i64} {
  func.func @_cross_attn_kernel(%arg0: i32, %arg1: i32, %arg2: memref<1x16x32xf32, #tpu.memory_space<vmem>>, %arg3: memref<1x4x48xf32, #tpu.memory_space<vmem>>, %arg4: memref<1x32xf32, #tpu.memory_space<vmem>>, %arg5: memref<1x32xf32, #tpu.memory_space<vmem>>, %arg6: memref<32x32xbf16, #tpu.memory_space<vmem>>, %arg7: memref<1x32xf32, #tpu.memory_space<vmem>>, %arg8: memref<48x64xbf16, #tpu.memory_space<vmem>>, %arg9: memref<1x64xf32, #tpu.memory_space<vmem>>, %arg10: memref<32x32xbf16, #tpu.memory_space<vmem>>, %arg11: memref<1x32xf32, #tpu.memory_space<vmem>>, %arg12: memref<1x16x32xf32, #tpu.memory_space<vmem>>, %arg13: memref<4x16x8xbf16, #tpu.memory_space<vmem>>, %arg14: memref<4x4x8xbf16, #tpu.memory_space<vmem>>, %arg15: memref<4x4x8xbf16, #tpu.memory_space<vmem>>, %arg16: memref<4x16x8xbf16, #tpu.memory_space<vmem>>) attributes {dimension_semantics = [#tpu.dimension_semantics<parallel>, #tpu.dimension_semantics<parallel>], iteration_bounds = array<i64: 2, 1>, scalar_prefetch = 0 : i64, scratch_operands = 4 : i64, tpu.core_type = #tpu.core_type<tc>, window_params = [{transform_indices = @transform_0, window_bounds = array<i64: 1, 16, 32>}, {transform_indices = @transform_1, window_bounds = array<i64: 1, 4, 48>}, {pipeline_mode = #tpu.pipeline_mode<synchronous>, transform_indices = @transform_2, window_bounds = array<i64: 1, 32>}, {pipeline_mode = #tpu.pipeline_mode<synchronous>, transform_indices = @transform_3, window_bounds = array<i64: 1, 32>}, {pipeline_mode = #tpu.pipeline_mode<synchronous>, transform_indices = @transform_4, window_bounds = array<i64: 32, 32>}, {pipeline_mode = #tpu.pipeline_mode<synchronous>, transform_indices = @transform_5, window_bounds = array<i64: 1, 32>}, {pipeline_mode = #tpu.pipeline_mode<synchronous>, transform_indices = @transform_6, window_bounds = array<i64: 48, 64>}, {pipeline_mode = #tpu.pipeline_mode<synchronous>, transform_indices = @transform_7, window_bounds = array<i64: 1, 64>}, {pipeline_mode = #tpu.pipeline_mode<synchronous>, transform_indices = @transform_8, window_bounds = array<i64: 32, 32>}, {pipeline_mode = #tpu.pipeline_mode<synchronous>, transform_indices = @transform_9, window_bounds = array<i64: 1, 32>}, {transform_indices = @transform_10, window_bounds = array<i64: 1, 16, 32>}]} {
    %c0 = arith.constant 0 : index
    %c0_0 = arith.constant 0 : index
    %c0_1 = arith.constant 0 : index
    %0 = vector.load %arg2[%c0, %c0_0, %c0_1] : memref<1x16x32xf32, #tpu.memory_space<vmem>>, vector<1x16x32xf32>
    %1 = vector.shape_cast %0 : vector<1x16x32xf32> to vector<16x32xf32>
    %c0_2 = arith.constant 0 : index
    %c0_3 = arith.constant 0 : index
    %2 = vector.load %arg4[%c0_2, %c0_3] : memref<1x32xf32, #tpu.memory_space<vmem>>, vector<1x32xf32>
    %c0_4 = arith.constant 0 : index
    %c0_5 = arith.constant 0 : index
    %3 = vector.load %arg5[%c0_4, %c0_5] : memref<1x32xf32, #tpu.memory_space<vmem>>, vector<1x32xf32>
    %cst = arith.constant dense<0.000000e+00> : vector<16xf32>
    %4 = vector.multi_reduction <add>, %1, %cst [1] : vector<16x32xf32> to vector<16xf32>
    %5 = vector.shape_cast %4 : vector<16xf32> to vector<16x1xf32>
    %cst_6 = arith.constant 3.200000e+01 : f32
    %6 = vector.broadcast %cst_6 : f32 to vector<16x1xf32>
    %7 = arith.divf %5, %6 : vector<16x1xf32>
    %8 = vector.broadcast %7 : vector<16x1xf32> to vector<16x32xf32>
    %9 = arith.subf %1, %8 : vector<16x32xf32>
    %10 = arith.mulf %9, %9 : vector<16x32xf32>
    %cst_7 = arith.constant dense<0.000000e+00> : vector<16xf32>
    %11 = vector.multi_reduction <add>, %10, %cst_7 [1] : vector<16x32xf32> to vector<16xf32>
    %12 = vector.shape_cast %11 : vector<16xf32> to vector<16x1xf32>
    %cst_8 = arith.constant 3.200000e+01 : f32
    %13 = vector.broadcast %cst_8 : f32 to vector<16x1xf32>
    %14 = arith.divf %12, %13 : vector<16x1xf32>
    %15 = vector.broadcast %7 : vector<16x1xf32> to vector<16x32xf32>
    %16 = arith.subf %1, %15 : vector<16x32xf32>
    %cst_9 = arith.constant 9.99999974E-6 : f32
    %17 = vector.broadcast %cst_9 : f32 to vector<16x1xf32>
    %18 = arith.addf %14, %17 : vector<16x1xf32>
    %19 = math.rsqrt %18 : vector<16x1xf32>
    %20 = vector.broadcast %19 : vector<16x1xf32> to vector<16x32xf32>
    %21 = arith.mulf %16, %20 : vector<16x32xf32>
    %22 = vector.broadcast %2 : vector<1x32xf32> to vector<16x32xf32>
    %23 = arith.mulf %21, %22 : vector<16x32xf32>
    %24 = vector.broadcast %3 : vector<1x32xf32> to vector<16x32xf32>
    %25 = arith.addf %23, %24 : vector<16x32xf32>
    %26 = arith.truncf %25 : vector<16x32xf32> to vector<16x32xbf16>
    %c0_10 = arith.constant 0 : index
    %c0_11 = arith.constant 0 : index
    %27 = vector.load %arg6[%c0_10, %c0_11] : memref<32x32xbf16, #tpu.memory_space<vmem>>, vector<32x32xbf16>
    %cst_12 = arith.constant dense<0.000000e+00> : vector<16x32xf32>
    %28 = tpu.matmul %26, %27, %cst_12 {dimension_numbers = #tpu.dot_dimension_numbers<[1], [0], [0], [1], [0, 0, 1, 1], [], []>} : vector<16x32xbf16>, vector<32x32xbf16>, vector<16x32xf32> -> vector<16x32xf32>
    %c0_13 = arith.constant 0 : index
    %c0_14 = arith.constant 0 : index
    %29 = vector.load %arg7[%c0_13, %c0_14] : memref<1x32xf32, #tpu.memory_space<vmem>>, vector<1x32xf32>
    %30 = vector.broadcast %29 : vector<1x32xf32> to vector<16x32xf32>
    %31 = arith.addf %28, %30 : vector<16x32xf32>
    %c0_15 = arith.constant 0 : index
    %c0_16 = arith.constant 0 : index
    %c0_17 = arith.constant 0 : index
    %32 = vector.load %arg3[%c0_15, %c0_16, %c0_17] : memref<1x4x48xf32, #tpu.memory_space<vmem>>, vector<1x4x48xf32>
    %33 = vector.shape_cast %32 : vector<1x4x48xf32> to vector<4x48xf32>
    %34 = arith.truncf %33 : vector<4x48xf32> to vector<4x48xbf16>
    %c0_18 = arith.constant 0 : index
    %c0_19 = arith.constant 0 : index
    %35 = vector.load %arg8[%c0_18, %c0_19] : memref<48x64xbf16, #tpu.memory_space<vmem>>, vector<48x64xbf16>
    %cst_20 = arith.constant dense<0.000000e+00> : vector<4x64xf32>
    %36 = tpu.matmul %34, %35, %cst_20 {dimension_numbers = #tpu.dot_dimension_numbers<[1], [0], [0], [1], [0, 0, 1, 1], [], []>} : vector<4x48xbf16>, vector<48x64xbf16>, vector<4x64xf32> -> vector<4x64xf32>
    %c0_21 = arith.constant 0 : index
    %c0_22 = arith.constant 0 : index
    %37 = vector.load %arg9[%c0_21, %c0_22] : memref<1x64xf32, #tpu.memory_space<vmem>>, vector<1x64xf32>
    %38 = vector.broadcast %37 : vector<1x64xf32> to vector<4x64xf32>
    %39 = arith.addf %36, %38 : vector<4x64xf32>
    %40 = vector.extract_strided_slice %31 {offsets = [0, 0], sizes = [16, 8], strides = [1, 1]} : vector<16x32xf32> to vector<16x8xf32>
    %41 = arith.truncf %40 : vector<16x8xf32> to vector<16x8xbf16>
    %c0_23 = arith.constant 0 : index
    %c0_24 = arith.constant 0 : index
    %c0_25 = arith.constant 0 : index
    %42 = vector.load %arg13[%c0_23, %c0_24, %c0_25] : memref<4x16x8xbf16, #tpu.memory_space<vmem>>, vector<1x16x8xbf16>
    %43 = vector.shape_cast %42 : vector<1x16x8xbf16> to vector<16x8xbf16>
    %44 = vector.shape_cast %41 : vector<16x8xbf16> to vector<1x16x8xbf16>
    tpu.vector_store %arg13[%c0_23, %c0_24, %c0_25], %44 {strides = array<i32>} : memref<4x16x8xbf16, #tpu.memory_space<vmem>>, vector<1x16x8xbf16>,
    %45 = vector.extract_strided_slice %39 {offsets = [0, 0], sizes = [4, 8], strides = [1, 1]} : vector<4x64xf32> to vector<4x8xf32>
    %46 = arith.truncf %45 : vector<4x8xf32> to vector<4x8xbf16>
    %c0_26 = arith.constant 0 : index
    %c0_27 = arith.constant 0 : index
    %c0_28 = arith.constant 0 : index
    %47 = vector.load %arg14[%c0_26, %c0_27, %c0_28] : memref<4x4x8xbf16, #tpu.memory_space<vmem>>, vector<1x4x8xbf16>
    %48 = vector.shape_cast %47 : vector<1x4x8xbf16> to vector<4x8xbf16>
    %49 = vector.shape_cast %46 : vector<4x8xbf16> to vector<1x4x8xbf16>
    tpu.vector_store %arg14[%c0_26, %c0_27, %c0_28], %49 {strides = array<i32>} : memref<4x4x8xbf16, #tpu.memory_space<vmem>>, vector<1x4x8xbf16>,
    %50 = vector.extract_strided_slice %39 {offsets = [0, 32], sizes = [4, 8], strides = [1, 1]} : vector<4x64xf32> to vector<4x8xf32>
    %51 = arith.truncf %50 : vector<4x8xf32> to vector<4x8xbf16>
    %c0_29 = arith.constant 0 : index
    %c0_30 = arith.constant 0 : index
    %c0_31 = arith.constant 0 : index
    %52 = vector.load %arg15[%c0_29, %c0_30, %c0_31] : memref<4x4x8xbf16, #tpu.memory_space<vmem>>, vector<1x4x8xbf16>
    %53 = vector.shape_cast %52 : vector<1x4x8xbf16> to vector<4x8xbf16>
    %54 = vector.shape_cast %51 : vector<4x8xbf16> to vector<1x4x8xbf16>
    tpu.vector_store %arg15[%c0_29, %c0_30, %c0_31], %54 {strides = array<i32>} : memref<4x4x8xbf16, #tpu.memory_space<vmem>>, vector<1x4x8xbf16>,
    %55 = vector.extract_strided_slice %31 {offsets = [0, 8], sizes = [16, 8], strides = [1, 1]} : vector<16x32xf32> to vector<16x8xf32>
    %56 = arith.truncf %55 : vector<16x8xf32> to vector<16x8xbf16>
    %c1 = arith.constant 1 : index
    %c0_32 = arith.constant 0 : index
    %c0_33 = arith.constant 0 : index
    %57 = vector.load %arg13[%c1, %c0_32, %c0_33] : memref<4x16x8xbf16, #tpu.memory_space<vmem>>, vector<1x16x8xbf16>
    %58 = vector.shape_cast %57 : vector<1x16x8xbf16> to vector<16x8xbf16>
    %59 = vector.shape_cast %56 : vector<16x8xbf16> to vector<1x16x8xbf16>
    tpu.vector_store %arg13[%c1, %c0_32, %c0_33], %59 {strides = array<i32>} : memref<4x16x8xbf16, #tpu.memory_space<vmem>>, vector<1x16x8xbf16>,
    %60 = vector.extract_strided_slice %39 {offsets = [0, 8], sizes = [4, 8], strides = [1, 1]} : vector<4x64xf32> to vector<4x8xf32>
    %61 = arith.truncf %60 : vector<4x8xf32> to vector<4x8xbf16>
    %c1_34 = arith.constant 1 : index
    %c0_35 = arith.constant 0 : index
    %c0_36 = arith.constant 0 : index
    %62 = vector.load %arg14[%c1_34, %c0_35, %c0_36] : memref<4x4x8xbf16, #tpu.memory_space<vmem>>, vector<1x4x8xbf16>
    %63 = vector.shape_cast %62 : vector<1x4x8xbf16> to vector<4x8xbf16>
    %64 = vector.shape_cast %61 : vector<4x8xbf16> to vector<1x4x8xbf16>
    tpu.vector_store %arg14[%c1_34, %c0_35, %c0_36], %64 {strides = array<i32>} : memref<4x4x8xbf16, #tpu.memory_space<vmem>>, vector<1x4x8xbf16>,
    %65 = vector.extract_strided_slice %39 {offsets = [0, 40], sizes = [4, 8], strides = [1, 1]} : vector<4x64xf32> to vector<4x8xf32>
    %66 = arith.truncf %65 : vector<4x8xf32> to vector<4x8xbf16>
    %c1_37 = arith.constant 1 : index
    %c0_38 = arith.constant 0 : index
    %c0_39 = arith.constant 0 : index
    %67 = vector.load %arg15[%c1_37, %c0_38, %c0_39] : memref<4x4x8xbf16, #tpu.memory_space<vmem>>, vector<1x4x8xbf16>
    %68 = vector.shape_cast %67 : vector<1x4x8xbf16> to vector<4x8xbf16>
    %69 = vector.shape_cast %66 : vector<4x8xbf16> to vector<1x4x8xbf16>
    tpu.vector_store %arg15[%c1_37, %c0_38, %c0_39], %69 {strides = array<i32>} : memref<4x4x8xbf16, #tpu.memory_space<vmem>>, vector<1x4x8xbf16>,
    %70 = vector.extract_strided_slice %31 {offsets = [0, 16], sizes = [16, 8], strides = [1, 1]} : vector<16x32xf32> to vector<16x8xf32>
    %71 = arith.truncf %70 : vector<16x8xf32> to vector<16x8xbf16>
    %c2 = arith.constant 2 : index
    %c0_40 = arith.constant 0 : index
    %c0_41 = arith.constant 0 : index
    %72 = vector.load %arg13[%c2, %c0_40, %c0_41] : memref<4x16x8xbf16, #tpu.memory_space<vmem>>, vector<1x16x8xbf16>
    %73 = vector.shape_cast %72 : vector<1x16x8xbf16> to vector<16x8xbf16>
    %74 = vector.shape_cast %71 : vector<16x8xbf16> to vector<1x16x8xbf16>
    tpu.vector_store %arg13[%c2, %c0_40, %c0_41], %74 {strides = array<i32>} : memref<4x16x8xbf16, #tpu.memory_space<vmem>>, vector<1x16x8xbf16>,
    %75 = vector.extract_strided_slice %39 {offsets = [0, 16], sizes = [4, 8], strides = [1, 1]} : vector<4x64xf32> to vector<4x8xf32>
    %76 = arith.truncf %75 : vector<4x8xf32> to vector<4x8xbf16>
    %c2_42 = arith.constant 2 : index
    %c0_43 = arith.constant 0 : index
    %c0_44 = arith.constant 0 : index
    %77 = vector.load %arg14[%c2_42, %c0_43, %c0_44] : memref<4x4x8xbf16, #tpu.memory_space<vmem>>, vector<1x4x8xbf16>
    %78 = vector.shape_cast %77 : vector<1x4x8xbf16> to vector<4x8xbf16>
    %79 = vector.shape_cast %76 : vector<4x8xbf16> to vector<1x4x8xbf16>
    tpu.vector_store %arg14[%c2_42, %c0_43, %c0_44], %79 {strides = array<i32>} : memref<4x4x8xbf16, #tpu.memory_space<vmem>>, vector<1x4x8xbf16>,
    %80 = vector.extract_strided_slice %39 {offsets = [0, 48], sizes = [4, 8], strides = [1, 1]} : vector<4x64xf32> to vector<4x8xf32>
    %81 = arith.truncf %80 : vector<4x8xf32> to vector<4x8xbf16>
    %c2_45 = arith.constant 2 : index
    %c0_46 = arith.constant 0 : index
    %c0_47 = arith.constant 0 : index
    %82 = vector.load %arg15[%c2_45, %c0_46, %c0_47] : memref<4x4x8xbf16, #tpu.memory_space<vmem>>, vector<1x4x8xbf16>
    %83 = vector.shape_cast %82 : vector<1x4x8xbf16> to vector<4x8xbf16>
    %84 = vector.shape_cast %81 : vector<4x8xbf16> to vector<1x4x8xbf16>
    tpu.vector_store %arg15[%c2_45, %c0_46, %c0_47], %84 {strides = array<i32>} : memref<4x4x8xbf16, #tpu.memory_space<vmem>>, vector<1x4x8xbf16>,
    %85 = vector.extract_strided_slice %31 {offsets = [0, 24], sizes = [16, 8], strides = [1, 1]} : vector<16x32xf32> to vector<16x8xf32>
    %86 = arith.truncf %85 : vector<16x8xf32> to vector<16x8xbf16>
    %c3 = arith.constant 3 : index
    %c0_48 = arith.constant 0 : index
    %c0_49 = arith.constant 0 : index
    %87 = vector.load %arg13[%c3, %c0_48, %c0_49] : memref<4x16x8xbf16, #tpu.memory_space<vmem>>, vector<1x16x8xbf16>
    %88 = vector.shape_cast %87 : vector<1x16x8xbf16> to vector<16x8xbf16>
    %89 = vector.shape_cast %86 : vector<16x8xbf16> to vector<1x16x8xbf16>
    tpu.vector_store %arg13[%c3, %c0_48, %c0_49], %89 {strides = array<i32>} : memref<4x16x8xbf16, #tpu.memory_space<vmem>>, vector<1x16x8xbf16>,
    %90 = vector.extract_strided_slice %39 {offsets = [0, 24], sizes = [4, 8], strides = [1, 1]} : vector<4x64xf32> to vector<4x8xf32>
    %91 = arith.truncf %90 : vector<4x8xf32> to vector<4x8xbf16>
    %c3_50 = arith.constant 3 : index
    %c0_51 = arith.constant 0 : index
    %c0_52 = arith.constant 0 : index
    %92 = vector.load %arg14[%c3_50, %c0_51, %c0_52] : memref<4x4x8xbf16, #tpu.memory_space<vmem>>, vector<1x4x8xbf16>
    %93 = vector.shape_cast %92 : vector<1x4x8xbf16> to vector<4x8xbf16>
    %94 = vector.shape_cast %91 : vector<4x8xbf16> to vector<1x4x8xbf16>
    tpu.vector_store %arg14[%c3_50, %c0_51, %c0_52], %94 {strides = array<i32>} : memref<4x4x8xbf16, #tpu.memory_space<vmem>>, vector<1x4x8xbf16>,
    %95 = vector.extract_strided_slice %39 {offsets = [0, 56], sizes = [4, 8], strides = [1, 1]} : vector<4x64xf32> to vector<4x8xf32>
    %96 = arith.truncf %95 : vector<4x8xf32> to vector<4x8xbf16>
    %c3_53 = arith.constant 3 : index
    %c0_54 = arith.constant 0 : index
    %c0_55 = arith.constant 0 : index
    %97 = vector.load %arg15[%c3_53, %c0_54, %c0_55] : memref<4x4x8xbf16, #tpu.memory_space<vmem>>, vector<1x4x8xbf16>
    %98 = vector.shape_cast %97 : vector<1x4x8xbf16> to vector<4x8xbf16>
    %99 = vector.shape_cast %96 : vector<4x8xbf16> to vector<1x4x8xbf16>
    tpu.vector_store %arg15[%c3_53, %c0_54, %c0_55], %99 {strides = array<i32>} : memref<4x4x8xbf16, #tpu.memory_space<vmem>>, vector<1x4x8xbf16>,
    %c0_i32 = arith.constant 0 : i32
    %c4_i32 = arith.constant 4 : i32
    %100 = arith.addi %c0_i32, %c4_i32 : i32
    %c1_i32 = arith.constant 1 : i32
    scf.for %arg17 = %c0_i32 to %100 step %c1_i32  : i32 {
      %119 = arith.index_cast %arg17 : i32 to index
      %c0_77 = arith.constant 0 : index
      %c0_78 = arith.constant 0 : index
      %120 = vector.load %arg13[%119, %c0_77, %c0_78] : memref<4x16x8xbf16, #tpu.memory_space<vmem>>, vector<1x16x8xbf16>
      %121 = vector.shape_cast %120 : vector<1x16x8xbf16> to vector<16x8xbf16>
      %122 = arith.index_cast %arg17 : i32 to index
      %c0_79 = arith.constant 0 : index
      %c0_80 = arith.constant 0 : index
      %123 = vector.load %arg14[%122, %c0_79, %c0_80] : memref<4x4x8xbf16, #tpu.memory_space<vmem>>, vector<1x4x8xbf16>
      %124 = vector.shape_cast %123 : vector<1x4x8xbf16> to vector<4x8xbf16>
      %cst_81 = arith.constant dense<0.000000e+00> : vector<16x4xf32>
      %125 = tpu.matmul %121, %124, %cst_81 {dimension_numbers = #tpu.dot_dimension_numbers<[1], [1], [0], [0], [0, 0, 1, 0], [], []>} : vector<16x8xbf16>, vector<4x8xbf16>, vector<16x4xf32> -> vector<16x4xf32>
      %cst_82 = arith.constant dense<0xFF800000> : vector<16xf32>
      %126 = vector.multi_reduction <maximumf>, %125, %cst_82 [1] : vector<16x4xf32> to vector<16xf32>
      %127 = vector.shape_cast %126 : vector<16xf32> to vector<16x1xf32>
      %128 = vector.broadcast %127 : vector<16x1xf32> to vector<16x4xf32>
      %129 = arith.subf %125, %128 : vector<16x4xf32>
      %130 = math.exp %129 : vector<16x4xf32>
      %cst_83 = arith.constant dense<0.000000e+00> : vector<16xf32>
      %131 = vector.multi_reduction <add>, %130, %cst_83 [1] : vector<16x4xf32> to vector<16xf32>
      %132 = vector.shape_cast %131 : vector<16xf32> to vector<16x1xf32>
      %133 = tpu.reciprocal %132 {approx = true} : vector<16x1xf32> -> vector<16x1xf32>
      %134 = vector.broadcast %133 : vector<16x1xf32> to vector<16x4xf32>
      %135 = arith.mulf %130, %134 : vector<16x4xf32>
      %136 = arith.truncf %135 : vector<16x4xf32> to vector<16x4xbf16>
      %137 = arith.index_cast %arg17 : i32 to index
      %c0_84 = arith.constant 0 : index
      %c0_85 = arith.constant 0 : index
      %138 = vector.load %arg15[%137, %c0_84, %c0_85] : memref<4x4x8xbf16, #tpu.memory_space<vmem>>, vector<1x4x8xbf16>
      %139 = vector.shape_cast %138 : vector<1x4x8xbf16> to vector<4x8xbf16>
      %cst_86 = arith.constant dense<0.000000e+00> : vector<16x8xf32>
      %140 = tpu.matmul %136, %139, %cst_86 {dimension_numbers = #tpu.dot_dimension_numbers<[1], [0], [0], [1], [0, 0, 1, 1], [], []>} : vector<16x4xbf16>, vector<4x8xbf16>, vector<16x8xf32> -> vector<16x8xf32>
      %141 = arith.truncf %140 : vector<16x8xf32> to vector<16x8xbf16>
      %142 = arith.index_cast %arg17 : i32 to index
      %c0_87 = arith.constant 0 : index
      %c0_88 = arith.constant 0 : index
      %143 = vector.load %arg16[%142, %c0_87, %c0_88] : memref<4x16x8xbf16, #tpu.memory_space<vmem>>, vector<1x16x8xbf16>
      %144 = vector.shape_cast %143 : vector<1x16x8xbf16> to vector<16x8xbf16>
      %145 = vector.shape_cast %141 : vector<16x8xbf16> to vector<1x16x8xbf16>
      tpu.vector_store %arg16[%142, %c0_87, %c0_88], %145 {strides = array<i32>} : memref<4x16x8xbf16, #tpu.memory_space<vmem>>, vector<1x16x8xbf16>,
    }
    %c4_i32_56 = arith.constant 4 : i32
    %c0_57 = arith.constant 0 : index
    %c0_58 = arith.constant 0 : index
    %c0_59 = arith.constant 0 : index
    %101 = vector.load %arg16[%c0_57, %c0_58, %c0_59] : memref<4x16x8xbf16, #tpu.memory_space<vmem>>, vector<1x16x8xbf16>
    %102 = vector.shape_cast %101 : vector<1x16x8xbf16> to vector<16x8xbf16>
    %c1_60 = arith.constant 1 : index
    %c0_61 = arith.constant 0 : index
    %c0_62 = arith.constant 0 : index
    %103 = vector.load %arg16[%c1_60, %c0_61, %c0_62] : memref<4x16x8xbf16, #tpu.memory_space<vmem>>, vector<1x16x8xbf16>
    %104 = vector.shape_cast %103 : vector<1x16x8xbf16> to vector<16x8xbf16>
    %c2_63 = arith.constant 2 : index
    %c0_64 = arith.constant 0 : index
    %c0_65 = arith.constant 0 : index
    %105 = vector.load %arg16[%c2_63, %c0_64, %c0_65] : memref<4x16x8xbf16, #tpu.memory_space<vmem>>, vector<1x16x8xbf16>
    %106 = vector.shape_cast %105 : vector<1x16x8xbf16> to vector<16x8xbf16>
    %c3_66 = arith.constant 3 : index
    %c0_67 = arith.constant 0 : index
    %c0_68 = arith.constant 0 : index
    %107 = vector.load %arg16[%c3_66, %c0_67, %c0_68] : memref<4x16x8xbf16, #tpu.memory_space<vmem>>, vector<1x16x8xbf16>
    %108 = vector.shape_cast %107 : vector<1x16x8xbf16> to vector<16x8xbf16>
    %109 = tpu.concatenate %102, %104, %106, %108 in 1 : vector<16x8xbf16>, vector<16x8xbf16>, vector<16x8xbf16>, vector<16x8xbf16> -> vector<16x32xbf16>
    %c0_69 = arith.constant 0 : index
    %c0_70 = arith.constant 0 : index
    %110 = vector.load %arg10[%c0_69, %c0_70] : memref<32x32xbf16, #tpu.memory_space<vmem>>, vector<32x32xbf16>
    %cst_71 = arith.constant dense<0.000000e+00> : vector<16x32xf32>
    %111 = tpu.matmul %109, %110, %cst_71 {dimension_numbers = #tpu.dot_dimension_numbers<[1], [0], [0], [1], [0, 0, 1, 1], [], []>} : vector<16x32xbf16>, vector<32x32xbf16>, vector<16x32xf32> -> vector<16x32xf32>
    %c0_72 = arith.constant 0 : index
    %c0_73 = arith.constant 0 : index
    %112 = vector.load %arg11[%c0_72, %c0_73] : memref<1x32xf32, #tpu.memory_space<vmem>>, vector<1x32xf32>
    %113 = vector.broadcast %112 : vector<1x32xf32> to vector<16x32xf32>
    %114 = arith.addf %111, %113 : vector<16x32xf32>
    %115 = arith.addf %1, %114 : vector<16x32xf32>
    %c0_74 = arith.constant 0 : index
    %c0_75 = arith.constant 0 : index
    %c0_76 = arith.constant 0 : index
    %116 = vector.load %arg12[%c0_74, %c0_75, %c0_76] : memref<1x16x32xf32, #tpu.memory_space<vmem>>, vector<1x16x32xf32>
    %117 = vector.shape_cast %116 : vector<1x16x32xf32> to vector<16x32xf32>
    %118 = vector.shape_cast %115 : vector<16x32xf32> to vector<1x16x32xf32>
    tpu.vector_store %arg12[%c0_74, %c0_75, %c0_76], %118 {strides = array<i32>} : memref<1x16x32xf32, #tpu.memory_space<vmem>>, vector<1x16x32xf32>,
    return
  }
  func.func @transform_0(%arg0: i32, %arg1: i32) -> (i32, i32, i32) {
    %c0_i32 = arith.constant 0 : i32
    %c0_i32_0 = arith.constant 0 : i32
    return %arg0, %arg1, %c0_i32 : i32, i32, i32
  }
  func.func @transform_1(%arg0: i32, %arg1: i32) -> (i32, i32, i32) {
    %c0_i32 = arith.constant 0 : i32
    %c0_i32_0 = arith.constant 0 : i32
    %c0_i32_1 = arith.constant 0 : i32
    return %arg0, %c0_i32, %c0_i32_0 : i32, i32, i32
  }
  func.func @transform_2(%arg0: i32, %arg1: i32) -> (i32, i32) {
    %c0_i32 = arith.constant 0 : i32
    %c0_i32_0 = arith.constant 0 : i32
    %c0_i32_1 = arith.constant 0 : i32
    return %c0_i32, %c0_i32_0 : i32, i32
  }
  func.func @transform_3(%arg0: i32, %arg1: i32) -> (i32, i32) {
    %c0_i32 = arith.constant 0 : i32
    %c0_i32_0 = arith.constant 0 : i32
    %c0_i32_1 = arith.constant 0 : i32
    return %c0_i32, %c0_i32_0 : i32, i32
  }
  func.func @transform_4(%arg0: i32, %arg1: i32) -> (i32, i32) {
    %c0_i32 = arith.constant 0 : i32
    %c0_i32_0 = arith.constant 0 : i32
    %c0_i32_1 = arith.constant 0 : i32
    return %c0_i32, %c0_i32_0 : i32, i32
  }
  func.func @transform_5(%arg0: i32, %arg1: i32) -> (i32, i32) {
    %c0_i32 = arith.constant 0 : i32
    %c0_i32_0 = arith.constant 0 : i32
    %c0_i32_1 = arith.constant 0 : i32
    return %c0_i32, %c0_i32_0 : i32, i32
  }
  func.func @transform_6(%arg0: i32, %arg1: i32) -> (i32, i32) {
    %c0_i32 = arith.constant 0 : i32
    %c0_i32_0 = arith.constant 0 : i32
    %c0_i32_1 = arith.constant 0 : i32
    return %c0_i32, %c0_i32_0 : i32, i32
  }
  func.func @transform_7(%arg0: i32, %arg1: i32) -> (i32, i32) {
    %c0_i32 = arith.constant 0 : i32
    %c0_i32_0 = arith.constant 0 : i32
    %c0_i32_1 = arith.constant 0 : i32
    return %c0_i32, %c0_i32_0 : i32, i32
  }
  func.func @transform_8(%arg0: i32, %arg1: i32) -> (i32, i32) {
    %c0_i32 = arith.constant 0 : i32
    %c0_i32_0 = arith.constant 0 : i32
    %c0_i32_1 = arith.constant 0 : i32
    return %c0_i32, %c0_i32_0 : i32, i32
  }
  func.func @transform_9(%arg0: i32, %arg1: i32) -> (i32, i32) {
    %c0_i32 = arith.constant 0 : i32
    %c0_i32_0 = arith.constant 0 : i32
    %c0_i32_1 = arith.constant 0 : i32
    return %c0_i32, %c0_i32_0 : i32, i32
  }
  func.func @transform_10(%arg0: i32, %arg1: i32) -> (i32, i32, i32) {
    %c0_i32 = arith.constant 0 : i32
    %c0_i32_0 = arith.constant 0 : i32
    return %arg0, %arg1, %c0_i32 : i32, i32, i32
  }
}

module attributes {stable_mosaic.version = 11 : i64} {
  func.func @_lm_head_kernel(%arg0: i32, %arg1: i32, %arg2: memref<16x32xf32, #tpu.memory_space<vmem>>, %arg3: memref<1x32xf32, #tpu.memory_space<vmem>>, %arg4: memref<1x32xf32, #tpu.memory_space<vmem>>, %arg5: memref<128x32xbf16, #tpu.memory_space<vmem>>, %arg6: memref<16x128xf32, #tpu.memory_space<vmem>>, %arg7: memref<16x32xbf16, #tpu.memory_space<vmem>>) attributes {dimension_semantics = [#tpu.dimension_semantics<parallel>, #tpu.dimension_semantics<arbitrary>], iteration_bounds = array<i64: 1, 1>, scalar_prefetch = 0 : i64, scratch_operands = 1 : i64, tpu.core_type = #tpu.core_type<tc>, window_params = [{transform_indices = @transform_0, window_bounds = array<i64: 16, 32>}, {pipeline_mode = #tpu.pipeline_mode<synchronous>, transform_indices = @transform_1, window_bounds = array<i64: 1, 32>}, {pipeline_mode = #tpu.pipeline_mode<synchronous>, transform_indices = @transform_2, window_bounds = array<i64: 1, 32>}, {transform_indices = @transform_3, window_bounds = array<i64: 128, 32>}, {transform_indices = @transform_4, window_bounds = array<i64: 16, 128>}]} {
    %c0_i32 = arith.constant 0 : i32
    %0 = arith.cmpi eq, %arg1, %c0_i32 : i32
    %1 = arith.extui %0 : i1 to i32
    %c0_i32_0 = arith.constant 0 : i32
    %2 = arith.cmpi ne, %1, %c0_i32_0 : i32
    scf.if %2 {
      %c0_6 = arith.constant 0 : index
      %c0_7 = arith.constant 0 : index
      %7 = vector.load %arg2[%c0_6, %c0_7] : memref<16x32xf32, #tpu.memory_space<vmem>>, vector<16x32xf32>
      %c0_8 = arith.constant 0 : index
      %c0_9 = arith.constant 0 : index
      %8 = vector.load %arg3[%c0_8, %c0_9] : memref<1x32xf32, #tpu.memory_space<vmem>>, vector<1x32xf32>
      %c0_10 = arith.constant 0 : index
      %c0_11 = arith.constant 0 : index
      %9 = vector.load %arg4[%c0_10, %c0_11] : memref<1x32xf32, #tpu.memory_space<vmem>>, vector<1x32xf32>
      %cst_12 = arith.constant dense<0.000000e+00> : vector<16xf32>
      %10 = vector.multi_reduction <add>, %7, %cst_12 [1] : vector<16x32xf32> to vector<16xf32>
      %11 = vector.shape_cast %10 : vector<16xf32> to vector<16x1xf32>
      %cst_13 = arith.constant 3.200000e+01 : f32
      %12 = vector.broadcast %cst_13 : f32 to vector<16x1xf32>
      %13 = arith.divf %11, %12 : vector<16x1xf32>
      %14 = vector.broadcast %13 : vector<16x1xf32> to vector<16x32xf32>
      %15 = arith.subf %7, %14 : vector<16x32xf32>
      %16 = arith.mulf %15, %15 : vector<16x32xf32>
      %cst_14 = arith.constant dense<0.000000e+00> : vector<16xf32>
      %17 = vector.multi_reduction <add>, %16, %cst_14 [1] : vector<16x32xf32> to vector<16xf32>
      %18 = vector.shape_cast %17 : vector<16xf32> to vector<16x1xf32>
      %cst_15 = arith.constant 3.200000e+01 : f32
      %19 = vector.broadcast %cst_15 : f32 to vector<16x1xf32>
      %20 = arith.divf %18, %19 : vector<16x1xf32>
      %21 = vector.broadcast %13 : vector<16x1xf32> to vector<16x32xf32>
      %22 = arith.subf %7, %21 : vector<16x32xf32>
      %cst_16 = arith.constant 9.99999974E-6 : f32
      %23 = vector.broadcast %cst_16 : f32 to vector<16x1xf32>
      %24 = arith.addf %20, %23 : vector<16x1xf32>
      %25 = math.rsqrt %24 : vector<16x1xf32>
      %26 = vector.broadcast %25 : vector<16x1xf32> to vector<16x32xf32>
      %27 = arith.mulf %22, %26 : vector<16x32xf32>
      %28 = vector.broadcast %8 : vector<1x32xf32> to vector<16x32xf32>
      %29 = arith.mulf %27, %28 : vector<16x32xf32>
      %30 = vector.broadcast %9 : vector<1x32xf32> to vector<16x32xf32>
      %31 = arith.addf %29, %30 : vector<16x32xf32>
      %32 = arith.truncf %31 : vector<16x32xf32> to vector<16x32xbf16>
      %c0_17 = arith.constant 0 : index
      %c0_18 = arith.constant 0 : index
      %33 = vector.load %arg7[%c0_17, %c0_18] : memref<16x32xbf16, #tpu.memory_space<vmem>>, vector<16x32xbf16>
      tpu.vector_store %arg7[%c0_17, %c0_18], %32 {strides = array<i32>} : memref<16x32xbf16, #tpu.memory_space<vmem>>, vector<16x32xbf16>,
    } else {
    }
    %c0 = arith.constant 0 : index
    %c0_1 = arith.constant 0 : index
    %3 = vector.load %arg7[%c0, %c0_1] : memref<16x32xbf16, #tpu.memory_space<vmem>>, vector<16x32xbf16>
    %c0_2 = arith.constant 0 : index
    %c0_3 = arith.constant 0 : index
    %4 = vector.load %arg5[%c0_2, %c0_3] : memref<128x32xbf16, #tpu.memory_space<vmem>>, vector<128x32xbf16>
    %cst = arith.constant dense<0.000000e+00> : vector<16x128xf32>
    %5 = tpu.matmul %3, %4, %cst {dimension_numbers = #tpu.dot_dimension_numbers<[1], [1], [0], [0], [0, 0, 1, 0], [], []>} : vector<16x32xbf16>, vector<128x32xbf16>, vector<16x128xf32> -> vector<16x128xf32>
    %c0_4 = arith.constant 0 : index
    %c0_5 = arith.constant 0 : index
    %6 = vector.load %arg6[%c0_4, %c0_5] : memref<16x128xf32, #tpu.memory_space<vmem>>, vector<16x128xf32>
    tpu.vector_store %arg6[%c0_4, %c0_5], %5 {strides = array<i32>} : memref<16x128xf32, #tpu.memory_space<vmem>>, vector<16x128xf32>,
    return
  }
  func.func @transform_0(%arg0: i32, %arg1: i32) -> (i32, i32) {
    %c0_i32 = arith.constant 0 : i32
    %c0_i32_0 = arith.constant 0 : i32
    return %arg0, %c0_i32 : i32, i32
  }
  func.func @transform_1(%arg0: i32, %arg1: i32) -> (i32, i32) {
    %c0_i32 = arith.constant 0 : i32
    %c0_i32_0 = arith.constant 0 : i32
    %c0_i32_1 = arith.constant 0 : i32
    return %c0_i32, %c0_i32_0 : i32, i32
  }
  func.func @transform_2(%arg0: i32, %arg1: i32) -> (i32, i32) {
    %c0_i32 = arith.constant 0 : i32
    %c0_i32_0 = arith.constant 0 : i32
    %c0_i32_1 = arith.constant 0 : i32
    return %c0_i32, %c0_i32_0 : i32, i32
  }
  func.func @transform_3(%arg0: i32, %arg1: i32) -> (i32, i32) {
    %c0_i32 = arith.constant 0 : i32
    %c0_i32_0 = arith.constant 0 : i32
    return %arg1, %c0_i32 : i32, i32
  }
  func.func @transform_4(%arg0: i32, %arg1: i32) -> (i32, i32) {
    %c0_i32 = arith.constant 0 : i32
    return %arg0, %arg1 : i32, i32
  }
}

</mosaic_0001>

<bundles_post_ra>
// kernel: biogpt_forward.12
= control target key start
LH: loop header
LB: loop body
LE: loop exit
PB: predicated region body
PF: predicated region fallthrough
CT: control target
= control target key end

     0   :  { %vm33_vm0 = vcmask 261120   ;;  %vm264_vm1 = vcmask 523264   ;;  %s526_s0 = inlined_call_operand.vmem [shape: f32[32,32], index: 0, kind: input, shape index: {}]   ;;  %s527_s3 = inlined_call_operand.vmem [shape: bf16[32,64], index: 3, kind: input, shape index: {}]   ;;  %s528_s1 = inlined_call_operand.vmem [shape: f32[1,32], index: 1, kind: input, shape index: {}]   ;;  %s529_s2 = inlined_call_operand.vmem [shape: f32[1,32], index: 2, kind: input, shape index: {}]   ;;  %s530_s5 = inlined_call_operand.vmem [shape: bf16[64,32], index: 5, kind: input, shape index: {}]   ;;  %s531_s4 = inlined_call_operand.vmem [shape: f32[1,64], index: 4, kind: input, shape index: {}]   ;;  %s532_s6 = inlined_call_operand.vmem [shape: f32[1,32], index: 6, kind: input, shape index: {}]   ;;  %s533_s7 = inlined_call_operand.vmem [shape: f32[32,32], index: 7, kind: output, shape index: {}]  }
   0x1   :  { %v441_v0 = vld [vmem:[%s526_s0] sm:$0xff]  ;;  %v446_v1 = vld [vmem:[%s526_s0 + $0x10] sm:$0xff]  ;;  %v451_v2 = vld [vmem:[%s526_s0 + $0x8] sm:$0xff] }
   0x2   :  { %v34_v3 = vsel %vm33_vm0, %v441_v0, 0.0  ;;  %v40_v4 = vsel %vm33_vm0, %v446_v1, 0.0  ;;  %v460_v5 = vld [vmem:[%s526_s0 + $0x18] sm:$0xff]  ;;  %v37_v6 = vsel %vm33_vm0, %v451_v2, 0.0  ;;  %v376_v28 = vld [vmem:[%s527_s3 + $0x8] sm:$0xff]   ;;  %v377_v29 = vld [vmem:[%s527_s3] sm:$0xff]  }
   0x3   :  { %35 = vadd.xlane.f32.xlu0 %v34_v3  ;;  %41 = vadd.xlane.f32.xlu1 %v40_v4  ;;  %v43_v7 = vsel %vm33_vm0, %v460_v5, 0.0  ;;  %v332_v44 = vld [vmem:[%s528_s1] ss:$0 sm:$0xff]  ;;  %v378_v62 = vld [vmem:[%s530_s5 + $0x18] sm:$0xff]   ;;  %v379_v63 = vld [vmem:[%s530_s5 + $0x10] sm:$0xff]  }
   0x4   :  { %356 = vmatprep.subr.bf16.mxu0 %v376_v28  ;;  %v333_v49 = vld [vmem:[%s529_s2] ss:$0 sm:$0xff]  ;;  %364 = vmatprep.subr.bf16.mxu1 %v378_v62  ;;  %v380_v3 = vld [vmem:[%s530_s5 + $0x8] sm:$0xff]  }
   0x5   :  { %357 = vmatpush3.bf16.msra.mxu0 %v376_v28  ;;  %365 = vmatpush3.bf16.msra.mxu1 %v378_v62  ;;  %v381_v4 = vld [vmem:[%s530_s5] sm:$0xff]  }
   0x6   :  { %358 = vmatprep.subr.bf16.mxu0 %v377_v29  ;;  %366 = vmatprep.subr.bf16.mxu1 %v379_v63 }
   0x7   :  { %38 = vadd.xlane.f32.xlu0 %v37_v6  ;;  %44 = vadd.xlane.f32.xlu1 %v43_v7  ;;  %v334_v6 = vld [vmem:[%s531_s4] ss:$0 sm:$0xff] }
   0x9   :  { %359 = vmatpush3.bf16.msra.mxu0 %v377_v29  ;;  %367 = vmatpush3.bf16.msra.mxu1 %v379_v63 }
   0xa   :  { %368 = vmatprep.subr.bf16.mxu1 %v380_v3 }
   0xd   :  { %369 = vmatpush3.bf16.msra.mxu1 %v380_v3 }
   0xe   :  { %370 = vmatprep.subr.bf16.mxu1 %v381_v4 }
  0x11   :  { %371 = vmatpush3.bf16.msra.mxu1 %v381_v4 }
  0x8c   :  { %v36_v8 = vpop.xlane.xlu0 %35  ;;  %v42_v9 = vpop.xlane.xlu1 %41 }
  0x8d   :  { %v47_v10 = vmul.f32 0.03125, %v36_v8  ;;  %v49_v11 = vmul.f32 0.03125, %v42_v9 }
  0x8f   :  { %v51_v12 = vsub.f32 %v441_v0, %v47_v10  ;;  %v53_v13 = vsub.f32 %v446_v1, %v49_v11 }
  0x90   :  { %v39_v14 = vpop.xlane.xlu0 %38  ;;  %v45_v15 = vpop.xlane.xlu1 %44 }
  0x91   :  { %v48_v16 = vmul.f32 0.03125, %v39_v14  ;;  %v50_v17 = vmul.f32 0.03125, %v45_v15  ;;  %v55_v18 = vmul.f32 %v51_v12, %v51_v12  ;;  %v57_v19 = vmul.f32 %v53_v13, %v53_v13 }
  0x93   :  { %v52_v20 = vsub.f32 %v451_v2, %v48_v16  ;;  %v54_v21 = vsub.f32 %v460_v5, %v50_v17  ;;  %v59_v22 = vsel %vm33_vm0, %v55_v18, 0.0  ;;  %v65_v23 = vsel %vm33_vm0, %v57_v19, 0.0 }
  0x94   :  { %60 = vadd.xlane.f32.xlu0 %v59_v22 }
  0x95   :  { %v56_v24 = vmul.f32 %v52_v20, %v52_v20  ;;  %v58_v25 = vmul.f32 %v54_v21, %v54_v21 }
  0x97   :  { %v62_v26 = vsel %vm33_vm0, %v56_v24, 0.0  ;;  %v68_v27 = vsel %vm33_vm0, %v58_v25, 0.0 }
  0x98   :  { %66 = vadd.xlane.f32.xlu0 %v65_v23  ;;  %63 = vadd.xlane.f32.xlu1 %v62_v26 }
  0x9c   :  { %69 = vadd.xlane.f32.xlu1 %v68_v27 }
 0x11d   :  { %v61_v30 = vpop.xlane.xlu0 %60 }
 0x11e   :  { %v71_v31 = vmul.f32 0.03125, %v61_v30 }
 0x120   :  { %v75_v32 = vadd.f32 1e-05, %v71_v31 }
 0x121   :  { %v64_v33 = vpop.xlane.xlu1 %63  ;;  %v67_v34 = vpop.xlane.xlu0 %66 }
 0x122   :  { %382 = vrsqrt.f32 %v75_v32  ;;  %v72_v35 = vmul.f32 0.03125, %v64_v33  ;;  %v73_v36 = vmul.f32 0.03125, %v67_v34 }
 0x124   :  { %v76_v37 = vadd.f32 1e-05, %v72_v35  ;;  %v77_v38 = vadd.f32 1e-05, %v73_v36 }
 0x125   :  { %v70_v39 = vpop.xlane.xlu1 %69 }
 0x126   :  { %384 = vrsqrt.f32 %v76_v37  ;;  %v74_v40 = vmul.f32 0.03125, %v70_v39 }
 0x127   :  { %386 = vrsqrt.f32 %v77_v38 }
 0x128   :  { %v78_v41 = vadd.f32 1e-05, %v74_v40 }
 0x12a   :  { %388 = vrsqrt.f32 %v78_v41 }
 0x12f   :  { %v383_v42 = vpop.eup %382 }
 0x130   :  { %v83_v43 = vmul.f32 %v383_v42, %v51_v12 }
 0x132   :  { %v93_v48 = vmul.f32 %v332_v44, %v83_v43 }
 0x133   :  { %v385_v45 = vpop.eup %384 }
 0x134   :  { %v387_v46 = vpop.eup %386  ;;  %v84_v47 = vmul.f32 %v385_v45, %v52_v20  ;;  %v103_v53 = vadd.f32 %v333_v49, %v93_v48 }
 0x135   :  { %v85_v50 = vmul.f32 %v387_v46, %v53_v13 }
 0x136   :  { %v94_v51 = vmul.f32 %v332_v44, %v84_v47 }
 0x137   :  { %v389_v52 = vpop.eup %388  ;;  %v95_v56 = vmul.f32 %v332_v44, %v85_v50 }
 0x138   :  { %v104_v54 = vadd.f32 %v333_v49, %v94_v51  ;;  %v86_v55 = vmul.f32 %v389_v52, %v54_v21 }
 0x139   :  { %v105_v59 = vadd.f32 %v333_v49, %v95_v56 }
 0x13a   :  { %v107_v57 = vpack.c.bf16 %v104_v54, %v103_v53  ;;  %v96_v58 = vmul.f32 %v332_v44, %v86_v55  ;;  %v339_v53 = vld [vmem:[%s532_s6] ss:$0 sm:$0xff] }
 0x13c   :  { %360 = vmatprep.mubr.msk.bf16.mxu0 %vm33_vm0, %v107_v57  ;;  %v106_v60 = vadd.f32 %v333_v49, %v96_v58 }
 0x13e   :  { %v108_v61 = vpack.c.bf16 %v106_v60, %v105_v59 }
 0x140   :  { %361 = vmatmul.mubr.msk.bf16.vlgmr.msra.gmra.mxu0 %vm33_vm0, %v108_v61 }
 0x200   :  { %v362_v7 = vpop.f32.mrf.mxu0 }
 0x201   :  { %v181_v8 = vadd.f32 %v362_v7, %v334_v6 }
 0x202   :  { %v172_v9 = vpop.f32.mrf.mxu0 }
 0x203   :  { %v193_v10 = vmul.f32 0.044715, %v181_v8  ;;  %v173_v11 = vadd.f32 %v334_v6, %v172_v9  ;;  %v189_v46 = vmul.f32 0.5, %v181_v8 }
 0x204   :  { %v363_v12 = vpop.f32.mrf.mxu0 }
 0x205   :  { %v197_v13 = vmul.f32 %v193_v10, %v181_v8  ;;  %v191_v14 = vmul.f32 0.044715, %v173_v11  ;;  %v184_v15 = vadd.f32 %v363_v12, %v334_v6  ;;  %v187_v43 = vmul.f32 0.5, %v173_v11 }
 0x206   :  { %v175_v16 = vpop.f32.mrf.mxu0 }
 0x207   :  { %v201_v17 = vmul.f32 %v197_v13, %v181_v8  ;;  %v195_v18 = vmul.f32 %v191_v14, %v173_v11  ;;  %v194_v19 = vmul.f32 0.044715, %v184_v15  ;;  %v176_v20 = vadd.f32 %v334_v6, %v175_v16 }
 0x208   :  { %v190_v41 = vmul.f32 0.5, %v184_v15 }
 0x209   :  { %v205_v21 = vadd.f32 %v201_v17, %v181_v8  ;;  %v198_v22 = vmul.f32 %v194_v19, %v184_v15  ;;  %v192_v23 = vmul.f32 0.044715, %v176_v20  ;;  %v199_v24 = vmul.f32 %v195_v18, %v173_v11 }
 0x20a   :  { %v188_v44 = vmul.f32 0.5, %v176_v20 }
 0x20b   :  { %v209_v25 = vmul.f32 0.7978846, %v205_v21  ;;  %v202_v26 = vmul.f32 %v198_v22, %v184_v15  ;;  %v196_v27 = vmul.f32 %v192_v23, %v176_v20  ;;  %v203_v28 = vadd.f32 %v199_v24, %v173_v11 }
 0x20d   :  { %v206_v29 = vadd.f32 %v202_v26, %v184_v15  ;;  %v200_v30 = vmul.f32 %v196_v27, %v176_v20  ;;  %v207_v31 = vmul.f32 0.7978846, %v203_v28  ;;  %390 = vtanh.f32 %v209_v25 }
 0x20f   :  { %v210_v32 = vmul.f32 0.7978846, %v206_v29  ;;  %v204_v33 = vadd.f32 %v200_v30, %v176_v20  ;;  %392 = vtanh.f32 %v207_v31 }
 0x211   :  { %394 = vtanh.f32 %v210_v32  ;;  %v208_v34 = vmul.f32 0.7978846, %v204_v33 }
 0x213   :  { %396 = vtanh.f32 %v208_v34 }
 0x21a   :  { %v391_v35 = vpop.eup %390 }
 0x21b   :  { %v217_v42 = vadd.f32 1.0, %v391_v35 }
 0x21c   :  { %v393_v36 = vpop.eup %392 }
 0x21d   :  { %v215_v38 = vadd.f32 1.0, %v393_v36  ;;  %v221_v50 = vmul.f32 %v217_v42, %v189_v46 }
 0x21e   :  { %v395_v37 = vpop.eup %394 }
 0x21f   :  { %v218_v39 = vadd.f32 1.0, %v395_v37  ;;  %v219_v48 = vmul.f32 %v215_v38, %v187_v43 }
 0x220   :  { %v397_v40 = vpop.eup %396 }
 0x221   :  { %v216_v45 = vadd.f32 1.0, %v397_v40  ;;  %v222_v47 = vmul.f32 %v218_v39, %v190_v41 }
 0x223   :  { %v220_v49 = vmul.f32 %v216_v45, %v188_v44  ;;  %v224_v52 = vpack.c.bf16 %v222_v47, %v221_v50 }
 0x225   :  { %v223_v51 = vpack.c.bf16 %v220_v49, %v219_v48 }
 0x227   :  { %372 = vmatprep.mubr.msk.bf16.mxu1 %vm264_vm1, %v223_v51 }
 0x228   :  { %373 = vmatmul.mubr.msk.bf16.vlgmr.msra.gmra.mxu1 %vm264_vm1, %v224_v52 }
 0x2e8   :  { %v374_v54 = vpop.f32.mrf.mxu1 }
 0x2e9   :  { %v314_v55 = vadd.f32 %v374_v54, %v339_v53 }
 0x2ea   :  { %v305_v56 = vpop.f32.mrf.mxu1 }
 0x2eb   :  { %v322_v57 = vadd.f32 %v314_v55, %v446_v1  ;;  %v306_v58 = vadd.f32 %v339_v53, %v305_v56 }
 0x2ec   :  { %v375_v59 = vpop.f32.mrf.mxu1 }
 0x2ed   :  { %326 = vst.msk [vmem:[%s533_s7 + $0x10] sm:$0xff] %vm33_vm0, %v322_v57  ;;  %v320_v60 = vadd.f32 %v306_v58, %v441_v0  ;;  %v317_v61 = vadd.f32 %v375_v59, %v339_v53 }
 0x2ee   :  { %v308_v62 = vpop.f32.mrf.mxu1 }
 0x2ef   :  { %324 = vst.msk [vmem:[%s533_s7] sm:$0xff] %vm33_vm0, %v320_v60  ;;  %v323_v63 = vadd.f32 %v317_v61, %v460_v5  ;;  %v309_v3 = vadd.f32 %v339_v53, %v308_v62 }
 0x2f1   :  { %327 = vst.msk [vmem:[%s533_s7 + $0x18] sm:$0xff] %vm33_vm0, %v323_v63  ;;  %v321_v1 = vadd.f32 %v309_v3, %v451_v2 }
 0x2f3   :  { %325 = vst.msk [vmem:[%s533_s7 + $0x8] sm:$0xff] %vm33_vm0, %v321_v1 }

// kernel: biogpt_forward.21
= control target key start
LH: loop header
LB: loop body
LE: loop exit
PB: predicated region body
PF: predicated region fallthrough
CT: control target
= control target key end

     0   :  { %vm27_vm0 = vcmask 261120   ;;  %s399_s0 = inlined_call_operand.vmem [shape: f32[16,32], index: 0, kind: input, shape index: {}]   ;;  %s400_s1 = inlined_call_operand.vmem [shape: f32[1,32], index: 1, kind: input, shape index: {}]   ;;  %s401_s2 = inlined_call_operand.vmem [shape: f32[1,32], index: 2, kind: input, shape index: {}]   ;;  %s402_s3 = inlined_call_operand.vmem [shape: bf16[128,32], index: 3, kind: input, shape index: {}]   ;;  %s403_s4 = inlined_call_operand.hbm [shape: f32[16,128], index: 4, kind: output, shape index: {}]  }
   0x1   :  { %v23_v0 = vld [vmem:[%s399_s0] sm:$0xff]  ;;  %v24_v1 = vld [vmem:[%s399_s0 + $0x8] sm:$0xff] }
   0x2   :  { %v28_v2 = vsel %vm27_vm0, %v23_v0, 0.0  ;;  %v31_v3 = vsel %vm27_vm0, %v24_v1, 0.0 }
   0x3   :  { %29 = vadd.xlane.f32.xlu0 %v28_v2 }
   0x7   :  { %32 = vadd.xlane.f32.xlu0 %v31_v3 }
   0x8   :  { %9 = vsyncpa [#allocation4], 0  ;;  %v282_v4 = vld [vmem:[%s402_s3 + $0x38] sm:$0xff]   ;;  %v317_v5 = vmov 0.0   ;;  %v283_v7 = vld [vmem:[%s402_s3 + $0x30] sm:$0xff]   ;;  %vm318_vm1 = vmmov 0  }
   0x9   :  { %257 = vmatprep.subr.bf16.mxu0 %v317_v5  ;;  %v171_v6 = vsel %vm27_vm0, %v282_v4, 0  ;;  %v168_v8 = vsel %vm27_vm0, %v283_v7, 0  ;;  %v284_v9 = vld [vmem:[%s402_s3 + $0x28] sm:$0xff]   ;;  %v285_v21 = vld [vmem:[%s402_s3 + $0x20] sm:$0xff]   ;;  %v286_v23 = vld [vmem:[%s402_s3 + $0x18] sm:$0xff]   ;;  %273 = vmatprep.mubr.msk.bf16.mxu0 %vm318_vm1, %v317_v5  ;;  %vm79_vm2 = vcmask 257024  }
   0xa   :  { %258 = vmatpush3.bf16.xpose.msra.mxu0 %v171_v6  ;;  %v165_v10 = vsel %vm27_vm0, %v284_v9, 0  ;;  %v162_v22 = vsel %vm27_vm0, %v285_v21, 0  ;;  %v159_v24 = vsel %vm27_vm0, %v286_v23, 0  ;;  %v287_v25 = vld [vmem:[%s402_s3 + $0x10] sm:$0xff]   ;;  %v288_v27 = vld [vmem:[%s402_s3 + $0x8] sm:$0xff]   ;;  %v289_v29 = vld [vmem:[%s402_s3] sm:$0xff]  }
   0xb   :  { %259 = vmatprep.subr.bf16.mxu0 %v317_v5  ;;  %v156_v26 = vsel %vm27_vm0, %v287_v25, 0  ;;  %v153_v28 = vsel %vm27_vm0, %v288_v27, 0  ;;  %v150_v30 = vsel %vm27_vm0, %v289_v29, 0  ;;  %v232_v38 = vld [vmem:[%s400_s1] ss:$0 sm:$0xff]  ;;  %s319_s1 = smov [#allocation3]  }
   0xc   :  { %v233_v40 = vld [vmem:[%s401_s2] ss:$0 sm:$0xff]  ;;  %s221_s11 = sshll.u32 %s319_s1, 4  ;;  %s222_s11 = int_to_ptr.vmem [resolvable:$true] %s221_s11 }
   0xd   :  { %s295_s2 = scalar_lea.vmem %s222_s11, 256  ;;  %p300_p1 = scmp.lt.s32.totalorder %s222_s11, %s222_s11 }
   0xe   :  { %p296_p0 = scmp.ne.s32.totalorder %s222_s11, %s295_s2  ;;  %p301_p2 = scmp.lt.s32.totalorder %s295_s2, %s295_s2 }
  0x10   :  { %p302_p3 = por %p301_p2, %p300_p1 }
  0x12   :  { %260 = vmatpush3.bf16.xpose.msra.mxu0 %v168_v8  ;;  %p303_p4 = pnand %p302_p3, %p296_p0 }
  0x13   :  { %261 = vmatprep.subr.bf16.mxu0 %v317_v5 }
  0x1a   :  { %262 = vmatpush3.bf16.xpose.msra.mxu0 %v165_v10 }
  0x1b   :  { %263 = vmatprep.subr.bf16.mxu0 %v317_v5 }
  0x22   :  { %264 = vmatpush3.bf16.xpose.msra.mxu0 %v162_v22 }
  0x23   :  { %265 = vmatprep.subr.bf16.mxu0 %v317_v5 }
  0x2a   :  { %266 = vmatpush3.bf16.xpose.msra.mxu0 %v159_v24 }
  0x2b   :  { %267 = vmatprep.subr.bf16.mxu0 %v317_v5 }
  0x32   :  { %268 = vmatpush3.bf16.xpose.msra.mxu0 %v156_v26 }
  0x33   :  { %269 = vmatprep.subr.bf16.mxu0 %v317_v5 }
  0x3a   :  { %270 = vmatpush3.bf16.xpose.msra.mxu0 %v153_v28 }
  0x3b   :  { %271 = vmatprep.subr.bf16.mxu0 %v317_v5 }
  0x42   :  { %272 = vmatpush3.bf16.xpose.msra.mxu0 %v150_v30 }
  0x8c   :  { %v30_v11 = vpop.xlane.xlu0 %29 }
  0x8d   :  { %v35_v12 = vmul.f32 0.03125, %v30_v11 }
  0x8f   :  { %v37_v13 = vsub.f32 %v23_v0, %v35_v12 }
  0x90   :  { %v33_v14 = vpop.xlane.xlu0 %32 }
  0x91   :  { %v36_v15 = vmul.f32 0.03125, %v33_v14  ;;  %v39_v16 = vmul.f32 %v37_v13, %v37_v13 }
  0x93   :  { %v38_v17 = vsub.f32 %v24_v1, %v36_v15  ;;  %v41_v18 = vsel %vm27_vm0, %v39_v16, 0.0 }
  0x94   :  { %42 = vadd.xlane.f32.xlu1 %v41_v18 }
  0x95   :  { %v40_v19 = vmul.f32 %v38_v17, %v38_v17 }
  0x97   :  { %v44_v20 = vsel %vm27_vm0, %v40_v19, 0.0 }
  0x98   :  { %45 = vadd.xlane.f32.xlu1 %v44_v20 }
 0x11d   :  { %v43_v31 = vpop.xlane.xlu1 %42 }
 0x11e   :  { %v47_v32 = vmul.f32 0.03125, %v43_v31 }
 0x120   :  { %v49_v33 = vadd.f32 1e-05, %v47_v32 }
 0x121   :  { %v46_v34 = vpop.xlane.xlu1 %45 }
 0x122   :  { %291 = vrsqrt.f32 %v49_v33  ;;  %v48_v35 = vmul.f32 0.03125, %v46_v34 }
 0x124   :  { %v50_v36 = vadd.f32 1e-05, %v48_v35 }
 0x126   :  { %293 = vrsqrt.f32 %v50_v36 }
 0x12f   :  { %v292_v37 = vpop.eup %291 }
 0x130   :  { %v53_v39 = vmul.f32 %v292_v37, %v37_v13 }
 0x132   :  { %v61_v41 = vmul.f32 %v232_v38, %v53_v39 }
 0x133   :  { %v294_v42 = vpop.eup %293 }
 0x134   :  { %v69_v43 = vadd.f32 %v233_v40, %v61_v41  ;;  %v54_v44 = vmul.f32 %v294_v42, %v38_v17 }
 0x136   :  { %v246_v45 = vpack.c.bf16 %v69_v43, %v69_v43  ;;  %v62_v46 = vmul.f32 %v232_v38, %v54_v44 }
 0x138   :  { %80 = vst.msk [vmem:[#allocation2] sm:$0xf] %vm79_vm2, %v246_v45  ;;  %v70_v47 = vadd.f32 %v233_v40, %v62_v46 }
 0x13a   :  { %v247_v48 = vpack.c.bf16 %v70_v47, %v70_v47 }
 0x13c   :  { %81 = vst.msk [vmem:[#allocation2 + $0x4] sm:$0xf] %vm79_vm2, %v247_v48 }
 0x143   :  { %v290_v49 = vld [vmem:[#allocation2] sm:$0xff]  }
 0x144   :  { %274 = vmatmul.mubr.msk.bf16.vlgmr.msra.gmra.mxu0 %vm27_vm0, %v290_v49 }
 0x204   :  { %v207_v50 = vpop.f32.mrf.mxu0 }
 0x205   :  { %214 = vst [vmem:[#allocation3] sm:$0xff] %v207_v50 }
 0x206   :  { %v275_v51 = vpop.f32.mrf.mxu0 }
 0x208   :  { %v210_v52 = vpop.f32.mrf.mxu0 }
 0x209   :  { %215 = vst [vmem:[#allocation3 + $0x8] sm:$0xff] %v210_v52 }
 0x20a   :  { %v276_v53 = vpop.f32.mrf.mxu0 }
 0x20b   :  { %306 = shalt.err (!%p303_p4)
}
 0x20c   :  { %s320_s12 = smov 128   ;;  %s321_s13 = smov 8  }
 0x20d   :  { %227 = dma.vmem_to_hbm [thread:$0]  %s222_s11, 256, %s403_s4, [#allocation4], %s320_s12, %s320_s12, %s321_s13  }
 0x20e   :  { %315 = dma.done.wait [#allocation4], 256  }
 0x20f   :  { %316 = vsyncadd [#allocation4], 4294967040 }
 0x210   :  { %231 = vsyncpa [#allocation4], 1 }

// kernel: biogpt_forward.16
= control target key start
LH: loop header
LB: loop body
LE: loop exit
PB: predicated region body
PF: predicated region fallthrough
CT: control target
= control target key end

     0   :  { %s1352_s13 = smov 0   ;;  %s1354_s14 = smov 0   ;;  %s1510_s0 = inlined_call_operand.vmem [shape: f32[2,16,32], index: 0, kind: input, shape index: {}]   ;;  %s1511_s1 = inlined_call_operand.vmem [shape: f32[2,4,48], index: 1, kind: input, shape index: {}]   ;;  %s1512_s2 = inlined_call_operand.vmem [shape: f32[1,32], index: 2, kind: input, shape index: {}]   ;;  %s1513_s3 = inlined_call_operand.vmem [shape: f32[1,32], index: 3, kind: input, shape index: {}]   ;;  %s1514_s4 = inlined_call_operand.vmem [shape: bf16[32,32], index: 4, kind: input, shape index: {}]   ;;  %s1515_s5 = inlined_call_operand.vmem [shape: f32[1,32], index: 5, kind: input, shape index: {}]   ;;  %s1516_s6 = inlined_call_operand.vmem [shape: bf16[48,64], index: 6, kind: input, shape index: {}]   ;;  %s1517_s7 = inlined_call_operand.vmem [shape: f32[1,64], index: 7, kind: input, shape index: {}]   ;;  %s1518_s8 = inlined_call_operand.vmem [shape: bf16[32,32], index: 8, kind: input, shape index: {}]   ;;  %s1519_s9 = inlined_call_operand.vmem [shape: f32[1,32], index: 9, kind: input, shape index: {}]   ;;  %s1520_s10 = inlined_call_operand.vmem [shape: f32[2,16,32], index: 10, kind: output, shape index: {}]  }
   0x1   :  { %s1356_s15 = smov 0  }
   0x2 LB: > { %s32_s16 = sadd.s32 1, %s1272_s14  ;;  %p1080_p0 = scmp.ge.s32.totalorder %s1276_s15, 1  ;;  %s1276_s15 = sphi %s1356_s15, %s20_s15   ;;  %s1272_s14 = sphi %s1354_s14, %s1522_s14   ;;  %s1268_s13 = sphi %s1352_s13, %s1521_s13  }
   0x3   : > { %p34_p1 = scmp.ge.s32.totalorder %s32_s16, 2  ;;  %p342_p2 = scmp.lt.s32.totalorder %s1276_s15, 3 }
   0x5   : > { %s1524_s16 = smov (%p34_p1, %s32_s16), 0  ;;  %p343_p3 = pnand %p1080_p0, %p342_p2 }
   0x6   : > { %p393_p4 = scmp.lt.s32.totalorder (!%p343_p3), %s1268_s13, 1  ;;  %s1285_s28 = smov (!%p343_p3), 96  }
   0x7   : > { %346 = sbr.rel (%p343_p3) target bundleno = 1715 (0x6b3), region = 60  ;;  %s1287_s30 = smov (!%p343_p3), 88  }
   0x8   : > { %s1288_s11 = smov (!%p343_p3), 112   ;;  %s1289_s12 = smov (!%p343_p3), 80  }
   0x9   : > { %s1290_s18 = smov (!%p343_p3), 104   ;;  %s1291_s19 = smov (!%p343_p3), 72  }
   0xc   : > { %s1526_s13 = smov (!%p393_p4, %s1268_s13), 1  ;;  %vm421_vm0 = vcmask 261120   ;;  %v1226_v14 = vld [vmem:[%s1516_s6 + $0x10] sm:$0xff]   ;;  %v1282_v15 = vmov 0.0   ;;  %v1227_v16 = vld [vmem:[%s1516_s6 + $0x8] sm:$0xff]   ;;  %v1228_v18 = vld [vmem:[%s1516_s6] sm:$0xff]   ;;  %v628_v41 = vlaneseq }
   0xd   : > { %s1119_s17 = sshll.u32 %s1526_s13, 4  ;;  %s1083_s24 = sshll.u32 %s1526_s13, 2  ;;  %1149 = vmatprep.subr.bf16.mxu1 %v1282_v15  ;;  %1141 = vmatprep.subr.bf16.mxu0 %v1282_v15  ;;  %v1229_v20 = vld [vmem:[%s1514_s4 + $0x8] sm:$0xff]   ;;  %vm1283_vm1 = vmmov 0   ;;  %vm566_vm2 = vcmask 392192   ;;  %v1230_v21 = vld [vmem:[%s1514_s4] sm:$0xff]  }
   0xe   : > { %s400_s20 = scalar_lea.vmem %s1510_s0, %s1119_s17  ;;  %s1379_s23 = scalar_lea.vmem %s1520_s10, %s1119_s17  ;;  %1150 = vmatpush3.bf16.msra.mxu1 %v1226_v14  ;;  %1155 = vmatprep.mubr.msk.bf16.mxu1 %vm1283_vm1, %v1282_v15  ;;  %v1086_v30 = vld [vmem:[%s1512_s2] ss:$0 sm:$0xff]  ;;  %v1284_v39 = vmov 1983009808   ;;  %v629_v43 = vshrl.u32 %v628_v41, 7  ;;  %vm622_vm3 = vcmask 58368  }
   0xf   : > { %v1381_v0 = vld [vmem:[%s400_s20] sm:$0xff]  ;;  %v1383_v1 = vld [vmem:[%s400_s20 + $0x8] sm:$0xff]  ;;  %s405_s29 = scalar_lea.vmem %s1511_s1, %s1083_s24  ;;  %1151 = vmatprep.subr.bf16.mxu1 %v1282_v15  ;;  %1142 = vmatpush3.bf16.msra.mxu0 %v1229_v20  ;;  %v626_v40 = vunpack.c.l.s4 %v1284_v39  ;;  %vm618_vm4 = vcmask 60416   ;;  %s1453_s20 = smov 0  }
  0x10   : > { %v422_v2 = vsel %vm421_vm0, %v1381_v0, 0.0  ;;  %v425_v3 = vsel %vm421_vm0, %v1383_v1, 0.0  ;;  %v533_v17 = vld [vmem:[%s405_s29] sm:$0xf]  ;;  %1145 = vmatprep.mubr.msk.bf16.mxu0 %vm1283_vm1, %v1282_v15  ;;  %1143 = vmatprep.subr.bf16.mxu0 %v1282_v15  ;;  %s1286_s29 = smov 120  }
  0x11   : > { %423 = vadd.xlane.f32.xlu0 %v422_v2  ;;  %v534_v19 = vpack.c.bf16 %v533_v17, %v533_v17  ;;  %v1087_v34 = vld [vmem:[%s1513_s3] ss:$0 sm:$0xff]  ;;  %v627_v42 = vunpack.c.0.s8 %v626_v40 }
  0x12   : > { %1152 = vmatpush3.bf16.msra.mxu1 %v1227_v16  ;;  %v1092_v44 = vld [vmem:[%s1517_s7] ss:$0 sm:$0xff] }
  0x13   : > { %1153 = vmatprep.subr.bf16.mxu1 %v1282_v15  ;;  %1144 = vmatpush3.bf16.msra.mxu0 %v1230_v21  ;;  %v630_v47 = vsub.s32 %v627_v42, %v629_v43  ;;  %v1088_v58 = vld [vmem:[%s1515_s5] ss:$0 sm:$0xff] }
  0x15   : > { %426 = vadd.xlane.f32.xlu0 %v425_v3 }
  0x16   : > { %1154 = vmatpush3.bf16.msra.mxu1 %v1228_v18 }
  0x19   : > { %1156 = vmatmul.mubr.msk.bf16.vlgmr.msra.gmra.mxu1 %vm566_vm2, %v534_v19 }
  0x9a   : > { %v424_v4 = vpop.xlane.xlu0 %423 }
  0x9b   : > { %v429_v5 = vmul.f32 0.03125, %v424_v4 }
  0x9d   : > { %v431_v6 = vsub.f32 %v1381_v0, %v429_v5 }
  0x9e   : > { %v427_v7 = vpop.xlane.xlu0 %426 }
  0x9f   : > { %v430_v8 = vmul.f32 0.03125, %v427_v7  ;;  %v433_v9 = vmul.f32 %v431_v6, %v431_v6 }
  0xa1   : > { %v432_v10 = vsub.f32 %v1383_v1, %v430_v8  ;;  %v435_v11 = vsel %vm421_vm0, %v433_v9, 0.0 }
  0xa2   : > { %436 = vadd.xlane.f32.xlu1 %v435_v11 }
  0xa3   : > { %v434_v12 = vmul.f32 %v432_v10, %v432_v10 }
  0xa5   : > { %v438_v13 = vsel %vm421_vm0, %v434_v12, 0.0 }
  0xa6   : > { %439 = vadd.xlane.f32.xlu1 %v438_v13 }
  0xd9   : > { %v604_v45 = vpop.f32.mrf.mxu1 }
  0xda   : > { %v605_v46 = vadd.f32 %v1092_v44, %v604_v45 }
  0xdb   : > { %v1157_v48 = vpop.f32.mrf.mxu1 }
  0xdc   : > { %v621_v49 = vpack.c.bf16 %v605_v46, %v605_v46 }
  0xdd   : > { %v607_v50 = vpop.f32.mrf.mxu1 }
  0xde   : > { %623 = vst.msk [vmem:[#allocation3] sm:$0x3] %vm622_vm3, %v621_v49  ;;  %v631_v51 = vrot.slane %v621_v49, %v630_v47 }
  0xdf   : > { %v1158_v52 = vpop.f32.mrf.mxu1 }
  0xe0   : > { %632 = vrot.lane.b32.xlu0 %v631_v51, %s1285_s28  ;;  %645 = vrot.lane.b32.xlu1 %v631_v51, %s1286_s29 }
  0xe4   : > { %650 = vrot.lane.b32.xlu0 %v631_v51, %s1287_s30  ;;  %664 = vrot.lane.b32.xlu1 %v631_v51, %s1288_s11 }
  0xe8   : > { %669 = vrot.lane.b32.xlu0 %v631_v51, %s1289_s12 }
 0x12b   : > { %v437_v22 = vpop.xlane.xlu1 %436 }
 0x12c   : > { %v441_v23 = vmul.f32 0.03125, %v437_v22 }
 0x12e   : > { %v443_v24 = vadd.f32 1e-05, %v441_v23 }
 0x12f   : > { %v440_v25 = vpop.xlane.xlu1 %439 }
 0x130   : > { %1231 = vrsqrt.f32 %v443_v24  ;;  %v442_v26 = vmul.f32 0.03125, %v440_v25 }
 0x132   : > { %v444_v27 = vadd.f32 1e-05, %v442_v26 }
 0x134   : > { %1233 = vrsqrt.f32 %v444_v27 }
 0x13d   : > { %v1232_v28 = vpop.eup %1231 }
 0x13e   : > { %v447_v29 = vmul.f32 %v1232_v28, %v431_v6 }
 0x140   : > { %v455_v33 = vmul.f32 %v1086_v30, %v447_v29 }
 0x141   : > { %v1234_v31 = vpop.eup %1233 }
 0x142   : > { %v448_v32 = vmul.f32 %v1234_v31, %v432_v10  ;;  %v463_v36 = vadd.f32 %v1087_v34, %v455_v33 }
 0x144   : > { %v456_v35 = vmul.f32 %v1086_v30, %v448_v32 }
 0x146   : > { %v464_v37 = vadd.f32 %v1087_v34, %v456_v35 }
 0x148   : > { %v465_v38 = vpack.c.bf16 %v464_v37, %v463_v36 }
 0x14a   : > { %1146 = vmatmul.mubr.msk.bf16.vlgmr.msra.gmra.mxu0 %vm421_vm0, %v465_v38 }
 0x152   : > { %v633_v53 = vpop.permute.xlu0 %632  ;;  %v646_v54 = vpop.permute.xlu1 %645 }
 0x153   : > { %635 = vst.msk [vmem:[#allocation4] sm:$0x3] %vm622_vm3, %v633_v53  ;;  %649 = vst.msk [vmem:[#allocation3 + $0x2] sm:$0x3] %vm622_vm3, %v646_v54 }
 0x156   : > { %v651_v55 = vpop.permute.xlu0 %650  ;;  %v665_v56 = vpop.permute.xlu1 %664 }
 0x157   : > { %654 = vst.msk [vmem:[#allocation4 + $0x2] sm:$0x3] %vm622_vm3, %v651_v55  ;;  %668 = vst.msk [vmem:[#allocation3 + $0x4] sm:$0x3] %vm622_vm3, %v665_v56 }
 0x15a   : > { %v670_v57 = vpop.permute.xlu0 %669 }
 0x15b   : > { %673 = vst.msk [vmem:[#allocation4 + $0x4] sm:$0x3] %vm622_vm3, %v670_v57 }
 0x20a   : > { %v526_v59 = vpop.f32.mrf.mxu0 }
 0x20b   : > { %v527_v60 = vadd.f32 %v1088_v58, %v526_v59 }
 0x20c   : > { %v1147_v61 = vpop.f32.mrf.mxu0 }
 0x20d   : > { %v1121_v62 = vpack.c.bf16 %v527_v60, %v527_v60 }
 0x20e   : > { %v529_v63 = vpop.f32.mrf.mxu0 }
 0x20f   : > { %619 = vst.msk [vmem:[#allocation2] sm:$0xf] %vm618_vm4, %v1121_v62  ;;  %v530_v2 = vadd.f32 %v1088_v58, %v529_v63  ;;  %636 = vrot.lane.b32.xlu1 %v1121_v62, %s1286_s29 }
 0x210   : > { %v1148_v3 = vpop.f32.mrf.mxu0 }
 0x211   : > { %v1122_v4 = vpack.c.bf16 %v530_v2, %v530_v2 }
 0x213   : > { %620 = vst.msk [vmem:[#allocation2 + $0x4] sm:$0xf] %vm618_vm4, %v1122_v4  ;;  %655 = vrot.lane.b32.xlu1 %v1121_v62, %s1288_s11  ;;  %657 = vrot.lane.b32.xlu0 %v1122_v4, %s1288_s11 }
 0x217   : > { %674 = vrot.lane.b32.xlu1 %v1121_v62, %s1290_s18  ;;  %676 = vrot.lane.b32.xlu0 %v1122_v4, %s1290_s18 }
 0x21b   : > { %688 = vrot.lane.b32.xlu0 %v631_v51, %s1291_s19  ;;  %638 = vrot.lane.b32.xlu1 %v1122_v4, %s1286_s29 }
 0x21f   : > { %683 = vrot.lane.b32.xlu1 %v631_v51, %s1290_s18 }
 0x281   : > { %v637_v5 = vpop.permute.xlu1 %636 }
 0x282   : > { %643 = vst.msk [vmem:[#allocation2 + $0x8] sm:$0xf] %vm618_vm4, %v637_v5 }
 0x285   : > { %v656_v6 = vpop.permute.xlu1 %655  ;;  %v658_v7 = vpop.permute.xlu0 %657 }
 0x286   : > { %662 = vst.msk [vmem:[#allocation2 + $0x10] sm:$0xf] %vm618_vm4, %v656_v6  ;;  %663 = vst.msk [vmem:[#allocation2 + $0x14] sm:$0xf] %vm618_vm4, %v658_v7 }
 0x289   : > { %v675_v8 = vpop.permute.xlu1 %674  ;;  %v677_v9 = vpop.permute.xlu0 %676 }
 0x28a   : > { %681 = vst.msk [vmem:[#allocation2 + $0x18] sm:$0xf] %vm618_vm4, %v675_v8  ;;  %682 = vst.msk [vmem:[#allocation2 + $0x1c] sm:$0xf] %vm618_vm4, %v677_v9 }
 0x28d   : > { %v639_v10 = vpop.permute.xlu1 %638  ;;  %v689_v11 = vpop.permute.xlu0 %688 }
 0x28e   : > { %644 = vst.msk [vmem:[#allocation2 + $0xc] sm:$0xf] %vm618_vm4, %v639_v10 }
 0x28f   : > { %692 = vst.msk [vmem:[#allocation4 + $0x6] sm:$0x3] %vm622_vm3, %v689_v11 }
 0x291   : > { %v684_v12 = vpop.permute.xlu1 %683 }
 0x292   : > { %687 = vst.msk [vmem:[#allocation3 + $0x6] sm:$0x3] %vm622_vm3, %v684_v12 }
 0x293 LB: >> { %v1292_v13 = vmov 0.0   ;;  %vm1293_vm5 = vmmov 0   ;;  %s1123_s21 = sshll.u32 %s1280_s20, 3  ;;  %s1101_s22 = sshll.u32 %s1280_s20, 1  ;;  %vm712_vm6 = vcmask 64512   ;;  %vm760_vm7 = vcmask 31744   ;;  %s1280_s20 = sphi %s1453_s20, %s698_s20  }
 0x294   : >> { %1159 = vmatprep.subr.bf16.mxu0 %v1292_v13  ;;  %1161 = vmatprep.mubr.msk.bf16.mxu0 %vm1293_vm5, %v1292_v13  ;;  %s701_s24 = scalar_lea.vmem [#allocation2], %s1123_s21  ;;  %s705_s25 = scalar_lea.vmem [#allocation3], %s1101_s22  ;;  %vm790_vm8 = vcmask 1041408  }
 0x295   : >> { %1165 = vmatprep.subr.bf16.mxu1 %v1292_v13  ;;  %1167 = vmatprep.mubr.msk.bf16.mxu1 %vm1293_vm5, %v1292_v13  ;;  %v1235_v17 = vld [vmem:[%s701_s24] sm:$0xff]   ;;  %s785_s26 = scalar_lea.vmem [#allocation4], %s1101_s22  ;;  %s844_s27 = scalar_lea.vmem [#allocation5], %s1123_s21 }
 0x296   : >> { %v786_v34 = vld [vmem:[%s785_s26] sm:$0x3]  ;;  %s698_s20 = sadd.s32 1, %s1280_s20  }
 0x297   : >> { %v792_v35 = vsel %vm790_vm8, %v786_v34, 0  ;;  %p695_p5 = scmp.ge.s32.totalorder %s698_s20, 4  }
 0x298   : >> { %1166 = vmatpush3.bf16.msra.mxu1 %v792_v35  ;;  %s1294_s28 = smov (%p695_p5), 8   ;;  %v1247_v52 = vld [vmem:[%s1518_s8 + $0x8] sm:$0xff] (%p695_p5)   ;;  %s1295_s11 = smov (%p695_p5), 24   ;;  %v1249_v53 = vld [vmem:[%s1518_s8] sm:$0xff] (%p695_p5)   ;;  %vm888_vm9 = vcmask (%p695_p5), 130048   ;;  %vm891_vm10 = vcmask (%p695_p5), 195584  }
 0x299   : >> { %v706_v14 = vld [vmem:[%s705_s25] sm:$0x3]  ;;  %s1296_s17 = smov (%p695_p5), 16  }
 0x29a   : >> { %v717_v16 = vsel %vm712_vm6, %v706_v14, 0  ;;  %v1113_v61 = vld [vmem:[%s1519_s9] ss:$0 sm:$0xff] (%p695_p5) }
 0x29b   : >> { %1160 = vmatpush3.bf16.xpose.msra.mxu0 %v717_v16 }
 0x29c   : > { %1171 = vmatprep.subr.bf16.mxu0 (%p695_p5), %v1282_v15 }
 0x2a2   : >> { %1162 = vmatmul.mubr.msk.bf16.vlgmr.msra.gmra.mxu0 %vm712_vm6, %v1235_v17 }
 0x2a3   : > { %1175 = vmatprep.mubr.msk.bf16.mxu0 (%p695_p5), %vm1283_vm1, %v1282_v15  ;;  %1172 = vmatpush3.bf16.msra.mxu0 (%p695_p5), %v1247_v52 }
 0x2a4   : > { %1173 = vmatprep.subr.bf16.mxu0 (%p695_p5), %v1282_v15 }
 0x2a7   : > { %1174 = vmatpush3.bf16.msra.mxu0 (%p695_p5), %v1249_v53 }
 0x362   : >> { %v753_v18 = vpop.f32.mrf.mxu0 }
 0x363   : >> { %v761_v19 = vsel %vm760_vm7, %v753_v18, -inf }
 0x364   : >> { %762 = vmax.xlane.f32.xlu0 %v761_v19  ;;  %v1163_v20 = vpop.f32.mrf.mxu0 }
 0x366   : >> { %v756_v21 = vpop.f32.mrf.mxu0 }
 0x367   : >> { %v764_v22 = vsel %vm760_vm7, %v756_v21, -inf }
 0x368   : >> { %765 = vmax.xlane.f32.xlu0 %v764_v22  ;;  %v1164_v23 = vpop.f32.mrf.mxu0 }
 0x3ed   : >> { %v763_v24 = vpop.xlane.xlu0 %762 }
 0x3ee   : >> { %v767_v25 = vsub.f32 %v753_v18, %v763_v24 }
 0x3f0   : >> { %v769_v26 = vmul.f32 1.442695, %v767_v25 }
 0x3f1   : >> { %v766_v27 = vpop.xlane.xlu0 %765 }
 0x3f2   : >> { %1236 = vpow2.f32 %v769_v26  ;;  %v768_v28 = vsub.f32 %v756_v21, %v766_v27 }
 0x3f4   : >> { %v771_v29 = vmul.f32 1.442695, %v768_v28 }
 0x3f6   : >> { %1238 = vpow2.f32 %v771_v29 }
 0x3ff   : >> { %v1237_v30 = vpop.eup %1236 }
 0x400   : >> { %v773_v31 = vsel %vm760_vm7, %v1237_v30, 0.0 }
 0x401   : >> { %774 = vadd.xlane.f32.xlu1 %v773_v31 }
 0x403   : >> { %v1239_v32 = vpop.eup %1238 }
 0x404   : >> { %v776_v33 = vsel %vm760_vm7, %v1239_v32, 0.0 }
 0x405   : >> { %777 = vadd.xlane.f32.xlu1 %v776_v33 }
 0x48a   : >> { %v775_v36 = vpop.xlane.xlu1 %774 }
 0x48b   : >> { %1240 = vrcp.f32 %v775_v36 }
 0x48e   : >> { %v778_v37 = vpop.xlane.xlu1 %777 }
 0x48f   : >> { %1242 = vrcp.f32 %v778_v37 }
 0x498   : >> { %v1241_v38 = vpop.eup %1240 }
 0x499   : >> { %v781_v40 = vmul.f32 %v1241_v38, %v1237_v30 }
 0x49c   : >> { %v1243_v39 = vpop.eup %1242 }
 0x49d   : >> { %v782_v41 = vmul.f32 %v1243_v39, %v1239_v32 }
 0x49f   : >> { %v783_v42 = vpack.c.bf16 %v782_v41, %v781_v40 }
 0x4a1   : >> { %1168 = vmatmul.mubr.msk.bf16.vlgmr.msra.gmra.mxu1 %vm760_vm7, %v783_v42 }
 0x561   : >> { %v828_v43 = vpop.f32.mrf.mxu1 }
 0x562   : >> { %v1124_v44 = vpack.c.bf16 %v828_v43, %v828_v43 }
 0x563   : >> { %v1169_v45 = vpop.f32.mrf.mxu1 }
 0x564   : >> { %845 = vst.msk [vmem:[%s844_s27] sm:$0xf] %vm618_vm4, %v1124_v44  ;;  %697 = sbr.rel (!%p695_p5) target bundleno = 659 (0x293), region = 116 }
 0x565   : >> { %v831_v46 = vpop.f32.mrf.mxu1 }
 0x566   : >> { %v1125_v47 = vpack.c.bf16 %v831_v46, %v831_v46 }
 0x567   : >> { %v1170_v48 = vpop.f32.mrf.mxu1 }
 0x568   : >> { %846 = vst.msk [vmem:[%s844_s27 + $0x4] sm:$0xf] %vm618_vm4, %v1125_v47 }
 0x56f   : > { %v1244_v49 = vld [vmem:[#allocation5 + $0x8] sm:$0xff]   ;;  %v1245_v50 = vld [vmem:[#allocation5 + $0x10] sm:$0xff]   ;;  %v1246_v51 = vld [vmem:[#allocation5 + $0x18] sm:$0xff]  }
 0x570   : > { %868 = vrot.lane.b32.xlu0 %v1244_v49, %s1294_s28  ;;  %882 = vrot.lane.b32.xlu1 %v1246_v51, %s1295_s11  ;;  %v1248_v55 = vld [vmem:[#allocation5] sm:$0xff]  }
 0x574   : > { %875 = vrot.lane.b32.xlu0 %v1245_v50, %s1296_s17 }
 0x5e2   : > { %v869_v54 = vpop.permute.xlu0 %868  ;;  %v883_v56 = vpop.permute.xlu1 %882 }
 0x5e3   : > { %v887_v57 = vsel %vm712_vm6, %v1248_v55, %v869_v54 }
 0x5e6   : > { %v876_v58 = vpop.permute.xlu0 %875 }
 0x5e7   : > { %v890_v59 = vsel %vm888_vm9, %v887_v57, %v876_v58 }
 0x5e8   : > { %v893_v60 = vsel %vm891_vm10, %v890_v59, %v883_v56 }
 0x5e9   : > { %1176 = vmatmul.mubr.msk.bf16.vlgmr.msra.gmra.mxu0 %vm421_vm0, %v893_v60 }
 0x6a9   : > { %v953_v15 = vpop.f32.mrf.mxu0 }
 0x6aa   : > { %v954_v62 = vadd.f32 %v1113_v61, %v953_v15 }
 0x6ab   : > { %v1177_v63 = vpop.f32.mrf.mxu0 }
 0x6ac   : > { %v960_v2 = vadd.f32 %v954_v62, %v1381_v0 }
 0x6ad   : > { %v956_v3 = vpop.f32.mrf.mxu0 }
 0x6ae   : > { %962 = vst.msk [vmem:[%s1379_s23] sm:$0xff] %vm421_vm0, %v960_v2  ;;  %v957_v4 = vadd.f32 %v1113_v61, %v956_v3 }
 0x6af   : > { %v1178_v5 = vpop.f32.mrf.mxu0 }
 0x6b0   : > { %v961_v6 = vadd.f32 %v957_v4, %v1383_v1 }
 0x6b2   : > { %963 = vst.msk [vmem:[%s1379_s23 + $0x8] sm:$0xff] %vm421_vm0, %v961_v6 }
 0x6b3 PF: > { %s20_s15 = sadd.s32 1, %s1276_s15   ;;  %s1521_s13 = smov %s1272_s14 }
 0x6b4   : > { %p17_p6 = scmp.ge.s32.totalorder %s20_s15, 4   ;;  %s1522_s14 = smov %s1524_s16 }
 0x6b6   :  { %19 = sbr.rel (!%p17_p6) target bundleno = 2 (0x2), region = 127 }

// kernel: biogpt_forward.11
= control target key start
LH: loop header
LB: loop body
LE: loop exit
PB: predicated region body
PF: predicated region fallthrough
CT: control target
= control target key end

     0   :  { %s1417_s13 = smov 0   ;;  %s1419_s14 = smov 0   ;;  %s1587_s0 = inlined_call_operand.vmem [shape: f32[2,16,32], index: 0, kind: input, shape index: {}]   ;;  %s1588_s1 = inlined_call_operand.vmem [shape: s32[2,1,16], index: 1, kind: input, shape index: {}]   ;;  %s1589_s2 = inlined_call_operand.vmem [shape: f32[1,32], index: 2, kind: input, shape index: {}]   ;;  %s1590_s3 = inlined_call_operand.vmem [shape: f32[1,32], index: 3, kind: input, shape index: {}]   ;;  %s1591_s4 = inlined_call_operand.vmem [shape: bf16[32,32], index: 4, kind: input, shape index: {}]   ;;  %s1592_s5 = inlined_call_operand.vmem [shape: f32[1,32], index: 5, kind: input, shape index: {}]   ;;  %s1593_s6 = inlined_call_operand.vmem [shape: bf16[32,64], index: 6, kind: input, shape index: {}]   ;;  %s1594_s7 = inlined_call_operand.vmem [shape: f32[1,64], index: 7, kind: input, shape index: {}]   ;;  %s1595_s8 = inlined_call_operand.vmem [shape: bf16[32,32], index: 8, kind: input, shape index: {}]   ;;  %s1596_s9 = inlined_call_operand.vmem [shape: f32[1,32], index: 9, kind: input, shape index: {}]   ;;  %s1597_s10 = inlined_call_operand.vmem [shape: f32[2,16,32], index: 10, kind: output, shape index: {}]  }
   0x1   :  { %s1421_s15 = smov 0  }
   0x2 LB: > { %s32_s16 = sadd.s32 1, %s1337_s14  ;;  %p1137_p0 = scmp.ge.s32.totalorder %s1341_s15, 1  ;;  %s1341_s15 = sphi %s1421_s15, %s20_s15   ;;  %s1337_s14 = sphi %s1419_s14, %s1603_s14   ;;  %s1333_s13 = sphi %s1417_s13, %s1602_s13  }
   0x3   : > { %p34_p1 = scmp.ge.s32.totalorder %s32_s16, 2  ;;  %p334_p2 = scmp.lt.s32.totalorder %s1341_s15, 3 }
   0x5   : > { %s1605_s16 = smov (%p34_p1, %s32_s16), 0  ;;  %p335_p3 = pnand %p1137_p0, %p334_p2 }
   0x6   : > { %p379_p4 = scmp.lt.s32.totalorder (!%p335_p3), %s1333_s13, 1  ;;  %s1350_s27 = smov (!%p335_p3), 96  }
   0x7   : > { %338 = sbr.rel (%p335_p3) target bundleno = 1740 (0x6cc), region = 60  ;;  %s1351_s28 = smov (!%p335_p3), 120  }
   0x8   : > { %s1352_s29 = smov (!%p335_p3), 88   ;;  %s1353_s30 = smov (!%p335_p3), 112  }
   0x9   : > { %s1354_s11 = smov (!%p335_p3), 80   ;;  %s1355_s12 = smov (!%p335_p3), 104  }
   0xc   : > { %v726_v0 = vlaneseq  ;;  %s1607_s13 = smov (!%p379_p4, %s1333_s13), 1  ;;  %vm403_vm0 = vcmask 261120   ;;  %v1347_v9 = vmov 0   ;;  %v1286_v35 = vld [vmem:[%s1593_s6 + $0x8] sm:$0xff]   ;;  %v1348_v37 = vmov 0.0   ;;  %v1287_v38 = vld [vmem:[%s1593_s6] sm:$0xff]  }
   0xd   : > { %s1178_s17 = sshll.u32 %s1607_s13, 4  ;;  %s386_s20 = scalar_lea.vmem %s1588_s1, %s1607_s13  ;;  %v1288_v36 = vld [vmem:[%s1591_s4 + $0x8] sm:$0xff]   ;;  %1203 = vmatprep.subr.bf16.mxu0 %v1348_v37  ;;  %1211 = vmatprep.subr.bf16.mxu1 %v1348_v37  ;;  %vm1349_vm7 = vmmov 0   ;;  %v1289_v39 = vld [vmem:[%s1591_s4] sm:$0xff]   ;;  %vm624_vm8 = vcmask 60416  }
   0xe   : > { %v727_v1 = vshrl.u32 %v726_v0, 7  ;;  %v733_v2 = vand.u32 127, %v726_v0  ;;  %s383_s23 = scalar_lea.vmem %s1587_s0, %s1178_s17  ;;  %s1444_s26 = scalar_lea.vmem %s1597_s10, %s1178_s17  ;;  %v736_v5 = vld [vmem:[%s386_s20] sm:$0x1]  ;;  %1204 = vmatpush3.bf16.msra.mxu0 %v1286_v35  ;;  %1212 = vmatpush3.bf16.msra.mxu1 %v1288_v36 }
   0xf   : > { %v1446_v6 = vld [vmem:[%s383_s23] sm:$0xff]  ;;  %vm737_vm1 = vcmp.gt.s32.totalorder %v736_v5, 0  ;;  %v1448_v7 = vld [vmem:[%s383_s23 + $0x8] sm:$0xff]  ;;  %1205 = vmatprep.subr.bf16.mxu0 %v1348_v37  ;;  %1207 = vmatprep.mubr.msk.bf16.mxu0 %vm1349_vm7, %v1348_v37  ;;  %s1356_s13 = smov 72   ;;  %s1528_s17 = smov 0  }
  0x10   : > { %v741_v3 = vsub.s32 0, %v727_v1  ;;  %v728_v4 = vadd.s32 8, %v727_v1  ;;  %v404_v8 = vsel %vm403_vm0, %v1446_v6, 0.0  ;;  %v738_v10 = vsel %vm737_vm1, 1, %v1347_v9  ;;  %1213 = vmatprep.subr.bf16.mxu1 %v1348_v37  ;;  %1215 = vmatprep.mubr.msk.bf16.mxu1 %vm1349_vm7, %v1348_v37  ;;  %v1142_v54 = vld [vmem:[%s1589_s2] ss:$0 sm:$0xff] }
  0x11   : > { %vm734_vm2 = vcmp.le.s32.totalorder %v733_v2, %v727_v1  ;;  %405 = vadd.xlane.f32.xlu0 %v404_v8  ;;  %519 = vadd.xlane.f32.xlu1 %v404_v8  ;;  %v407_v12 = vsel %vm403_vm0, %v1448_v7, 0.0  ;;  %v1143_v59 = vld [vmem:[%s1590_s3] ss:$0 sm:$0xff] }
  0x12   : > { %v742_v11 = vrot.slane %v738_v10, %v741_v3  ;;  %vm735_vm3 = vcmp.le.s32.totalorder %v733_v2, %v728_v4  ;;  %1206 = vmatpush3.bf16.msra.mxu0 %v1287_v38  ;;  %1214 = vmatpush3.bf16.msra.mxu1 %v1289_v39  ;;  %v1144_v10 = vld [vmem:[%s1594_s7] ss:$0 sm:$0xff] }
  0x14   : > { %vm743_vm4 = vcmp.eq.s32.totalorder %v742_v11, 1 }
  0x15   : > { %vm1454_vm5 = vmand %vm734_vm2, %vm743_vm4  ;;  %408 = vadd.xlane.f32.xlu0 %v407_v12  ;;  %522 = vadd.xlane.f32.xlu1 %v407_v12 }
  0x16   : > { %vm1458_vm6 = vmand %vm735_vm3, %vm743_vm4 }
  0x9a   : > { %v406_v15 = vpop.xlane.xlu0 %405  ;;  %v520_v16 = vpop.xlane.xlu1 %519 }
  0x9b   : > { %v411_v17 = vmul.f32 0.03125, %v406_v15  ;;  %v524_v18 = vmul.f32 0.03125, %v520_v16  ;;  %v1148_v16 = vld [vmem:[%s1592_s5] ss:$0 sm:$0xff] }
  0x9d   : > { %v413_v19 = vsub.f32 %v1446_v6, %v411_v17  ;;  %v526_v20 = vsub.f32 %v1446_v6, %v524_v18 }
  0x9e   : > { %v409_v21 = vpop.xlane.xlu0 %408  ;;  %v523_v22 = vpop.xlane.xlu1 %522 }
  0x9f   : > { %v412_v23 = vmul.f32 0.03125, %v409_v21  ;;  %v525_v24 = vmul.f32 0.03125, %v523_v22  ;;  %v415_v25 = vmul.f32 %v413_v19, %v413_v19  ;;  %v528_v26 = vmul.f32 %v526_v20, %v526_v20 }
  0xa1   : > { %v414_v27 = vsub.f32 %v1448_v7, %v412_v23  ;;  %v527_v28 = vsub.f32 %v1448_v7, %v525_v24  ;;  %v417_v29 = vsel %vm403_vm0, %v415_v25, 0.0  ;;  %v530_v30 = vsel %vm403_vm0, %v528_v26, 0.0 }
  0xa2   : > { %418 = vadd.xlane.f32.xlu0 %v417_v29 }
  0xa3   : > { %v416_v31 = vmul.f32 %v414_v27, %v414_v27  ;;  %v529_v32 = vmul.f32 %v527_v28, %v527_v28 }
  0xa5   : > { %v420_v33 = vsel %vm403_vm0, %v416_v31, 0.0  ;;  %v533_v34 = vsel %vm403_vm0, %v529_v32, 0.0 }
  0xa6   : > { %531 = vadd.xlane.f32.xlu0 %v530_v30  ;;  %421 = vadd.xlane.f32.xlu1 %v420_v33 }
  0xaa   : > { %534 = vadd.xlane.f32.xlu1 %v533_v34 }
 0x12b   : > { %v419_v40 = vpop.xlane.xlu0 %418 }
 0x12c   : > { %v423_v41 = vmul.f32 0.03125, %v419_v40 }
 0x12e   : > { %v425_v42 = vadd.f32 1e-05, %v423_v41 }
 0x12f   : > { %v422_v43 = vpop.xlane.xlu1 %421  ;;  %v532_v44 = vpop.xlane.xlu0 %531 }
 0x130   : > { %1290 = vrsqrt.f32 %v425_v42  ;;  %v424_v45 = vmul.f32 0.03125, %v422_v43  ;;  %v536_v46 = vmul.f32 0.03125, %v532_v44 }
 0x132   : > { %v426_v47 = vadd.f32 1e-05, %v424_v45  ;;  %v538_v48 = vadd.f32 1e-05, %v536_v46 }
 0x133   : > { %v535_v49 = vpop.xlane.xlu1 %534 }
 0x134   : > { %1292 = vrsqrt.f32 %v426_v47  ;;  %v537_v50 = vmul.f32 0.03125, %v535_v49 }
 0x135   : > { %1294 = vrsqrt.f32 %v538_v48 }
 0x136   : > { %v539_v51 = vadd.f32 1e-05, %v537_v50 }
 0x138   : > { %1296 = vrsqrt.f32 %v539_v51 }
 0x13d   : > { %v1291_v52 = vpop.eup %1290 }
 0x13e   : > { %v429_v53 = vmul.f32 %v1291_v52, %v413_v19 }
 0x140   : > { %v437_v58 = vmul.f32 %v1142_v54, %v429_v53 }
 0x141   : > { %v1293_v55 = vpop.eup %1292 }
 0x142   : > { %v1295_v56 = vpop.eup %1294  ;;  %v430_v57 = vmul.f32 %v1293_v55, %v414_v27  ;;  %v445_v63 = vadd.f32 %v1143_v59, %v437_v58 }
 0x143   : > { %v542_v60 = vmul.f32 %v1295_v56, %v526_v20 }
 0x144   : > { %v438_v61 = vmul.f32 %v1142_v54, %v430_v57 }
 0x145   : > { %v1297_v62 = vpop.eup %1296  ;;  %v544_v2 = vmul.f32 %v1142_v54, %v542_v60 }
 0x146   : > { %v446_v0 = vadd.f32 %v1143_v59, %v438_v61  ;;  %v543_v1 = vmul.f32 %v1297_v62, %v527_v28 }
 0x147   : > { %v546_v5 = vadd.f32 %v1143_v59, %v544_v2 }
 0x148   : > { %v447_v3 = vpack.c.bf16 %v446_v0, %v445_v63  ;;  %v545_v4 = vmul.f32 %v1142_v54, %v543_v1 }
 0x14a   : > { %1208 = vmatmul.mubr.msk.bf16.vlgmr.msra.gmra.mxu0 %vm403_vm0, %v447_v3  ;;  %v547_v8 = vadd.f32 %v1143_v59, %v545_v4 }
 0x14c   : > { %v548_v9 = vpack.c.bf16 %v547_v8, %v546_v5 }
 0x14e   : > { %1216 = vmatmul.mubr.msk.bf16.vlgmr.msra.gmra.mxu1 %vm403_vm0, %v548_v9 }
 0x20a   : > { %v508_v11 = vpop.f32.mrf.mxu0 }
 0x20b   : > { %v509_v12 = vadd.f32 %v1144_v10, %v508_v11 }
 0x20c   : > { %v1209_v15 = vpop.f32.mrf.mxu0 }
 0x20d   : > { %v1182_v17 = vpack.c.bf16 %v509_v12, %v509_v12 }
 0x20e   : > { %v511_v18 = vpop.f32.mrf.mxu0  ;;  %v609_v19 = vpop.f32.mrf.mxu1 }
 0x20f   : > { %635 = vst.msk [vmem:[#allocation3] sm:$0xf] %vm624_vm8, %v1182_v17  ;;  %v512_v20 = vadd.f32 %v1144_v10, %v511_v18  ;;  %v610_v21 = vadd.f32 %v1148_v16, %v609_v19  ;;  %637 = vrot.lane.b32.xlu0 %v1182_v17, %s1350_s27 }
 0x210   : > { %v1210_v22 = vpop.f32.mrf.mxu0  ;;  %v1217_v23 = vpop.f32.mrf.mxu1 }
 0x211   : > { %v1183_v24 = vpack.c.bf16 %v512_v20, %v512_v20  ;;  %v1180_v25 = vpack.c.bf16 %v610_v21, %v610_v21 }
 0x212   : > { %v612_v26 = vpop.f32.mrf.mxu1 }
 0x213   : > { %636 = vst.msk [vmem:[#allocation3 + $0x4] sm:$0xf] %vm624_vm8, %v1183_v24  ;;  %625 = vst.msk [vmem:[#allocation2] sm:$0xf] %vm624_vm8, %v1180_v25  ;;  %v613_v27 = vadd.f32 %v1148_v16, %v612_v26  ;;  %654 = vrot.lane.b32.xlu0 %v1182_v17, %s1351_s28  ;;  %645 = vrot.lane.b32.xlu1 %v1180_v25, %s1351_s28 }
 0x214   : > { %v1218_v28 = vpop.f32.mrf.mxu1 }
 0x215   : > { %v1181_v29 = vpack.c.bf16 %v613_v27, %v613_v27 }
 0x217   : > { %626 = vst.msk [vmem:[#allocation2 + $0x4] sm:$0xf] %vm624_vm8, %v1181_v29  ;;  %663 = vrot.lane.b32.xlu0 %v1182_v17, %s1352_s29  ;;  %639 = vrot.lane.b32.xlu1 %v1183_v24, %s1350_s27 }
 0x21b   : > { %672 = vrot.lane.b32.xlu0 %v1180_v25, %s1353_s30  ;;  %647 = vrot.lane.b32.xlu1 %v1181_v29, %s1351_s28 }
 0x21f   : > { %681 = vrot.lane.b32.xlu0 %v1182_v17, %s1353_s30  ;;  %656 = vrot.lane.b32.xlu1 %v1183_v24, %s1351_s28 }
 0x223   : > { %690 = vrot.lane.b32.xlu0 %v1182_v17, %s1354_s11  ;;  %665 = vrot.lane.b32.xlu1 %v1183_v24, %s1352_s29 }
 0x227   : > { %699 = vrot.lane.b32.xlu0 %v1180_v25, %s1355_s12  ;;  %674 = vrot.lane.b32.xlu1 %v1181_v29, %s1353_s30 }
 0x22b   : > { %708 = vrot.lane.b32.xlu0 %v1182_v17, %s1355_s12  ;;  %683 = vrot.lane.b32.xlu1 %v1183_v24, %s1353_s30 }
 0x22f   : > { %717 = vrot.lane.b32.xlu0 %v1182_v17, %s1356_s13  ;;  %692 = vrot.lane.b32.xlu1 %v1183_v24, %s1354_s11 }
 0x233   : > { %701 = vrot.lane.b32.xlu1 %v1181_v29, %s1355_s12 }
 0x237   : > { %710 = vrot.lane.b32.xlu1 %v1183_v24, %s1355_s12 }
 0x23b   : > { %719 = vrot.lane.b32.xlu1 %v1183_v24, %s1356_s13 }
 0x281   : > { %v638_v30 = vpop.permute.xlu0 %637 }
 0x282   : > { %643 = vst.msk [vmem:[#allocation4] sm:$0xf] %vm624_vm8, %v638_v30 }
 0x285   : > { %v646_v31 = vpop.permute.xlu1 %645  ;;  %v655_v32 = vpop.permute.xlu0 %654 }
 0x286   : > { %652 = vst.msk [vmem:[#allocation2 + $0x8] sm:$0xf] %vm624_vm8, %v646_v31  ;;  %661 = vst.msk [vmem:[#allocation3 + $0x8] sm:$0xf] %vm624_vm8, %v655_v32 }
 0x289   : > { %v640_v33 = vpop.permute.xlu1 %639  ;;  %v664_v34 = vpop.permute.xlu0 %663 }
 0x28a   : > { %644 = vst.msk [vmem:[#allocation4 + $0x4] sm:$0xf] %vm624_vm8, %v640_v33  ;;  %670 = vst.msk [vmem:[#allocation4 + $0x8] sm:$0xf] %vm624_vm8, %v664_v34 }
 0x28d   : > { %v648_v35 = vpop.permute.xlu1 %647  ;;  %v673_v36 = vpop.permute.xlu0 %672 }
 0x28e   : > { %653 = vst.msk [vmem:[#allocation2 + $0xc] sm:$0xf] %vm624_vm8, %v648_v35  ;;  %679 = vst.msk [vmem:[#allocation2 + $0x10] sm:$0xf] %vm624_vm8, %v673_v36 }
 0x291   : > { %v657_v38 = vpop.permute.xlu1 %656  ;;  %v682_v39 = vpop.permute.xlu0 %681 }
 0x292   : > { %662 = vst.msk [vmem:[#allocation3 + $0xc] sm:$0xf] %vm624_vm8, %v657_v38  ;;  %688 = vst.msk [vmem:[#allocation3 + $0x10] sm:$0xf] %vm624_vm8, %v682_v39 }
 0x295   : > { %v666_v40 = vpop.permute.xlu1 %665  ;;  %v691_v41 = vpop.permute.xlu0 %690 }
 0x296   : > { %671 = vst.msk [vmem:[#allocation4 + $0xc] sm:$0xf] %vm624_vm8, %v666_v40  ;;  %697 = vst.msk [vmem:[#allocation4 + $0x10] sm:$0xf] %vm624_vm8, %v691_v41 }
 0x299   : > { %v675_v42 = vpop.permute.xlu1 %674  ;;  %v700_v43 = vpop.permute.xlu0 %699 }
 0x29a   : > { %680 = vst.msk [vmem:[#allocation2 + $0x14] sm:$0xf] %vm624_vm8, %v675_v42  ;;  %706 = vst.msk [vmem:[#allocation2 + $0x18] sm:$0xf] %vm624_vm8, %v700_v43 }
 0x29d   : > { %v684_v44 = vpop.permute.xlu1 %683  ;;  %v709_v45 = vpop.permute.xlu0 %708 }
 0x29e   : > { %689 = vst.msk [vmem:[#allocation3 + $0x14] sm:$0xf] %vm624_vm8, %v684_v44  ;;  %715 = vst.msk [vmem:[#allocation3 + $0x18] sm:$0xf] %vm624_vm8, %v709_v45 }
 0x2a1   : > { %v693_v46 = vpop.permute.xlu1 %692  ;;  %v718_v47 = vpop.permute.xlu0 %717 }
 0x2a2   : > { %698 = vst.msk [vmem:[#allocation4 + $0x14] sm:$0xf] %vm624_vm8, %v693_v46  ;;  %724 = vst.msk [vmem:[#allocation4 + $0x18] sm:$0xf] %vm624_vm8, %v718_v47 }
 0x2a5   : > { %v702_v48 = vpop.permute.xlu1 %701 }
 0x2a6   : > { %707 = vst.msk [vmem:[#allocation2 + $0x1c] sm:$0xf] %vm624_vm8, %v702_v48 }
 0x2a9   : > { %v711_v49 = vpop.permute.xlu1 %710 }
 0x2aa   : > { %716 = vst.msk [vmem:[#allocation3 + $0x1c] sm:$0xf] %vm624_vm8, %v711_v49 }
 0x2ad   : > { %v720_v50 = vpop.permute.xlu1 %719 }
 0x2ae   : > { %725 = vst.msk [vmem:[#allocation4 + $0x1c] sm:$0xf] %vm624_vm8, %v720_v50 }
 0x2af LB: >> { %v1357_v51 = vmov 0.0   ;;  %vm1358_vm9 = vmmov 0   ;;  %s1534_s18 = sshll.u32 %s1345_s17, 3  ;;  %vm771_vm10 = vcmask 64512   ;;  %vm821_vm11 = vcmask 130048   ;;  %s751_s17 = sadd.s32 1, %s1345_s17   ;;  %s1345_s17 = sphi %s1528_s17, %s751_s17  }
 0x2b0   : >> { %1219 = vmatprep.subr.bf16.mxu0 %v1357_v51  ;;  %1221 = vmatprep.mubr.msk.bf16.mxu0 %vm1358_vm9, %v1357_v51  ;;  %s758_s19 = scalar_lea.vmem [#allocation3], %s1534_s18  ;;  %s754_s20 = scalar_lea.vmem [#allocation2], %s1534_s18 }
 0x2b1   : >> { %1225 = vmatprep.subr.bf16.mxu1 %v1357_v51  ;;  %1227 = vmatprep.mubr.msk.bf16.mxu1 %vm1358_vm9, %v1357_v51  ;;  %v1298_v52 = vld [vmem:[%s758_s19] sm:$0xff]   ;;  %s846_s21 = scalar_lea.vmem [#allocation4], %s1534_s18  ;;  %s908_s22 = scalar_lea.vmem [#allocation5], %s1534_s18 }
 0x2b2   : >> { %v776_v53 = vsel %vm771_vm10, %v1298_v52, 0  ;;  %v1299_v54 = vld [vmem:[%s754_s20] sm:$0xff]   ;;  %p748_p5 = scmp.ge.s32.totalorder %s751_s17, 4  }
 0x2b3   : >> { %1220 = vmatpush3.bf16.xpose.msra.mxu0 %v776_v53  ;;  %s1359_s23 = smov (%p748_p5), 8   ;;  %v1312_v30 = vld [vmem:[%s1595_s8 + $0x8] sm:$0xff] (%p748_p5)   ;;  %s1360_s27 = smov (%p748_p5), 24   ;;  %v1314_v13 = vld [vmem:[%s1595_s8] sm:$0xff] (%p748_p5)   ;;  %vm955_vm12 = vcmask (%p748_p5), 195584  }
 0x2b4   : > { %1231 = vmatprep.subr.bf16.mxu0 (%p748_p5), %v1348_v37  ;;  %s1361_s30 = smov (%p748_p5), 16   ;;  %v1172_v38 = vld [vmem:[%s1596_s9] ss:$0 sm:$0xff] (%p748_p5) }
 0x2b5   : >> { %v1300_v11 = vld [vmem:[%s846_s21] sm:$0xff]  }
 0x2b6   : >> { %1226 = vmatpush3.bf16.msra.mxu1 %v1300_v11 }
 0x2ba   : >> { %1222 = vmatmul.mubr.msk.bf16.vlgmr.msra.gmra.mxu0 %vm771_vm10, %v1299_v54 }
 0x2bb   : > { %1235 = vmatprep.mubr.msk.bf16.mxu0 (%p748_p5), %vm1349_vm7, %v1348_v37  ;;  %1232 = vmatpush3.bf16.msra.mxu0 (%p748_p5), %v1312_v30 }
 0x2bc   : > { %1233 = vmatprep.subr.bf16.mxu0 (%p748_p5), %v1348_v37 }
 0x2bf   : > { %1234 = vmatpush3.bf16.msra.mxu0 (%p748_p5), %v1314_v13 }
 0x37a   : >> { %v812_v55 = vpop.f32.mrf.mxu0 }
 0x37b   : >> { %v819_v56 = vsel %vm1454_vm5, %v812_v55, -1e+09 }
 0x37c   : >> { %v1223_v57 = vpop.f32.mrf.mxu0  ;;  %v822_v58 = vsel %vm821_vm11, %v819_v56, -inf }
 0x37d   : >> { %823 = vmax.xlane.f32.xlu0 %v822_v58 }
 0x37e   : >> { %v815_v59 = vpop.f32.mrf.mxu0 }
 0x37f   : >> { %v820_v60 = vsel %vm1458_vm6, %v815_v59, -1e+09 }
 0x380   : >> { %v1224_v61 = vpop.f32.mrf.mxu0  ;;  %v825_v62 = vsel %vm821_vm11, %v820_v60, -inf }
 0x381   : >> { %826 = vmax.xlane.f32.xlu0 %v825_v62 }
 0x406   : >> { %v824_v63 = vpop.xlane.xlu0 %823 }
 0x407   : >> { %v828_v0 = vsub.f32 %v819_v56, %v824_v63 }
 0x409   : >> { %v830_v1 = vmul.f32 1.442695, %v828_v0 }
 0x40a   : >> { %v827_v2 = vpop.xlane.xlu0 %826 }
 0x40b   : >> { %1301 = vpow2.f32 %v830_v1  ;;  %v829_v3 = vsub.f32 %v820_v60, %v827_v2 }
 0x40d   : >> { %v832_v4 = vmul.f32 1.442695, %v829_v3 }
 0x40f   : >> { %1303 = vpow2.f32 %v832_v4 }
 0x418   : >> { %v1302_v5 = vpop.eup %1301 }
 0x419   : >> { %v834_v8 = vsel %vm821_vm11, %v1302_v5, 0.0 }
 0x41a   : >> { %835 = vadd.xlane.f32.xlu1 %v834_v8 }
 0x41c   : >> { %v1304_v9 = vpop.eup %1303 }
 0x41d   : >> { %v837_v10 = vsel %vm821_vm11, %v1304_v9, 0.0 }
 0x41e   : >> { %838 = vadd.xlane.f32.xlu1 %v837_v10 }
 0x4a3   : >> { %v836_v12 = vpop.xlane.xlu1 %835 }
 0x4a4   : >> { %1305 = vrcp.f32 %v836_v12 }
 0x4a7   : >> { %v839_v15 = vpop.xlane.xlu1 %838 }
 0x4a8   : >> { %1307 = vrcp.f32 %v839_v15 }
 0x4b1   : >> { %v1306_v16 = vpop.eup %1305 }
 0x4b2   : >> { %v842_v18 = vmul.f32 %v1306_v16, %v1302_v5 }
 0x4b5   : >> { %v1308_v17 = vpop.eup %1307 }
 0x4b6   : >> { %v843_v19 = vmul.f32 %v1308_v17, %v1304_v9 }
 0x4b8   : >> { %v844_v20 = vpack.c.bf16 %v843_v19, %v842_v18 }
 0x4ba   : >> { %1228 = vmatmul.mubr.msk.bf16.vlgmr.msra.gmra.mxu1 %vm821_vm11, %v844_v20 }
 0x57a   : >> { %v892_v21 = vpop.f32.mrf.mxu1 }
 0x57b   : >> { %v1187_v22 = vpack.c.bf16 %v892_v21, %v892_v21 }
 0x57c   : >> { %v1229_v23 = vpop.f32.mrf.mxu1 }
 0x57d   : >> { %909 = vst.msk [vmem:[%s908_s22] sm:$0xf] %vm624_vm8, %v1187_v22  ;;  %750 = sbr.rel (!%p748_p5) target bundleno = 687 (0x2af), region = 117 }
 0x57e   : >> { %v895_v24 = vpop.f32.mrf.mxu1 }
 0x57f   : >> { %v1188_v25 = vpack.c.bf16 %v895_v24, %v895_v24 }
 0x580   : >> { %v1230_v26 = vpop.f32.mrf.mxu1 }
 0x581   : >> { %910 = vst.msk [vmem:[%s908_s22 + $0x4] sm:$0xf] %vm624_vm8, %v1188_v25 }
 0x588   : > { %v1309_v27 = vld [vmem:[#allocation5 + $0x8] sm:$0xff]   ;;  %v1310_v28 = vld [vmem:[#allocation5 + $0x10] sm:$0xff]   ;;  %v1311_v29 = vld [vmem:[#allocation5 + $0x18] sm:$0xff]  }
 0x589   : > { %932 = vrot.lane.b32.xlu0 %v1309_v27, %s1359_s23  ;;  %946 = vrot.lane.b32.xlu1 %v1311_v29, %s1360_s27  ;;  %v1313_v31 = vld [vmem:[#allocation5] sm:$0xff]  }
 0x58d   : > { %939 = vrot.lane.b32.xlu0 %v1310_v28, %s1361_s30 }
 0x5fb   : > { %v933_v14 = vpop.permute.xlu0 %932  ;;  %v947_v32 = vpop.permute.xlu1 %946 }
 0x5fc   : > { %v951_v33 = vsel %vm771_vm10, %v1313_v31, %v933_v14 }
 0x5ff   : > { %v940_v34 = vpop.permute.xlu0 %939 }
 0x600   : > { %v954_v35 = vsel %vm821_vm11, %v951_v33, %v940_v34 }
 0x601   : > { %v957_v36 = vsel %vm955_vm12, %v954_v35, %v947_v32 }
 0x602   : > { %1236 = vmatmul.mubr.msk.bf16.vlgmr.msra.gmra.mxu0 %vm403_vm0, %v957_v36 }
 0x6c2   : > { %v1017_v37 = vpop.f32.mrf.mxu0 }
 0x6c3   : > { %v1018_v39 = vadd.f32 %v1172_v38, %v1017_v37 }
 0x6c4   : > { %v1237_v40 = vpop.f32.mrf.mxu0 }
 0x6c5   : > { %v1024_v41 = vadd.f32 %v1018_v39, %v1446_v6 }
 0x6c6   : > { %v1020_v42 = vpop.f32.mrf.mxu0 }
 0x6c7   : > { %1026 = vst.msk [vmem:[%s1444_s26] sm:$0xff] %vm403_vm0, %v1024_v41  ;;  %v1021_v43 = vadd.f32 %v1172_v38, %v1020_v42 }
 0x6c8   : > { %v1238_v44 = vpop.f32.mrf.mxu0 }
 0x6c9   : > { %v1025_v45 = vadd.f32 %v1021_v43, %v1448_v7 }
 0x6cb   : > { %1027 = vst.msk [vmem:[%s1444_s26 + $0x8] sm:$0xff] %vm403_vm0, %v1025_v45 }
 0x6cc PF: > { %s20_s15 = sadd.s32 1, %s1341_s15   ;;  %s1602_s13 = smov %s1337_s14 }
 0x6cd   : > { %p17_p6 = scmp.ge.s32.totalorder %s20_s15, 4   ;;  %s1603_s14 = smov %s1605_s16 }
 0x6cf   :  { %19 = sbr.rel (!%p17_p6) target bundleno = 2 (0x2), region = 128 }

</bundles_post_ra>
